<compile_context>
chip_gen: v7x
topology: tpu7x:2x2x1
jax: 0.10.0
libtpu: 0.0.40
codegen_flags: <defaults>
</compile_context>

<pallas_src>
import jax
import jax.numpy as jnp
from jax.experimental import pallas as pl
from jax.experimental.pallas import tpu as pltpu


def _round_up(x, m):
    return ((x + m - 1) // m) * m


def _replication_counts(in_size, out_size=32):
    """How many of the `out_size` nearest-neighbor destinations map to each src index.

    PyTorch nearest: src = (dst * in_size) // out_size.
    """
    idx = (jnp.arange(out_size, dtype=jnp.int32) * in_size) // out_size
    return jnp.zeros((in_size,), jnp.float32).at[idx].add(1.0)


def _fused_pool_linear_kernel(x_ref, w_ref, b_ref, o_ref):
    # x_ref: (TILE_N, K)   w_ref: (K, 128)   b_ref: (1, 128)   o_ref: (TILE_N, 128)
    acc = jnp.dot(
        x_ref[...],
        w_ref[...],
        preferred_element_type=jnp.float32,
        precision=jax.lax.Precision.HIGHEST,   # free: kernel is HBM-bound
    )
    o_ref[...] = (acc + b_ref[...]).astype(o_ref.dtype)


def evo_cnn_forward(x, weight, bias, *, tile_n=2048):
    """x: (N, C, H, W).  weight: (OUT, C) (PyTorch layout).  bias: (OUT,)."""
    n, c, h, w = x.shape
    out_dim = weight.shape[0]
    k = c * h * w
    out_pad = 128  # lane-dense output tile; real outputs live in [:, :out_dim]

    # ---- Fold upsample(32x32) + AdaptiveAvgPool2d((1,1)) + Linear into W_big ----
    cnt_h = _replication_counts(h, 32)                            # (H,)
    cnt_w = _replication_counts(w, 32)                            # (W,)
    spatial = (cnt_h[:, None] * cnt_w[None, :]) / float(32 * 32)  # (H, W), sums to 1
    # W_big[c*H*W + i*W + j, o] = weight[o, c] * spatial[i, j]
    w_big = (weight.T.astype(jnp.float32)[:, None, None, :]
             * spatial[None, :, :, None]).reshape(k, out_dim)
    w_pad = jnp.zeros((k, out_pad), jnp.float32).at[:, :out_dim].set(w_big)
    w_pad = w_pad.astype(x.dtype)   # match activation dtype (bf16 stays bf16)
    b_pad = jnp.zeros((1, out_pad), jnp.float32).at[:, :out_dim].set(
        bias.astype(jnp.float32))   # bias added to the f32 accumulator

    # ---- Lane-dense activation layout: (N, C*H*W); native dtype, no pad/copy ----
    x2d = x.reshape(n, k)

    # ---- Batch tiling: cdiv grid, ragged last block handled by Pallas ----
    tile_n = max(8, min(tile_n, _round_up(n, 8)))        # sublane-aligned
    if 8 < n <= tile_n:
        # Split a single full-batch block into 2 so the "parallel" axis can
        # shard across both TensorCores on v7x.
        tile_n = _round_up(pl.cdiv(n, 2), 8)
    grid = (pl.cdiv(n, tile_n),)

    out = pl.pallas_call(
        _fused_pool_linear_kernel,
        out_shape=jax.ShapeDtypeStruct((n, out_pad), x.dtype),
        grid_spec=pltpu.PrefetchScalarGridSpec(
            num_scalar_prefetch=0,
            grid=grid,
            in_specs=[
                pl.BlockSpec((tile_n, k), lambda i: (i, 0)),      # activations
                pl.BlockSpec((k, out_pad), lambda i: (0, 0)),     # fused weights
                pl.BlockSpec((1, out_pad), lambda i: (0, 0)),     # bias
            ],
            out_specs=pl.BlockSpec((tile_n, out_pad), lambda i: (i, 0)),
        ),
        compiler_params=pltpu.CompilerParams(
            dimension_semantics=("parallel",),          # shard batch across TCs (v7x)
            vmem_limit_bytes=48 * 1024 * 1024,          # headroom for tile_n up to 4096
        ),
    )(x2d, w_pad, b_pad)

    # Only the padded output columns are sliced off (no row copy needed).
    return out[:, :out_dim]


if __name__ == "__main__":
    key = jax.random.PRNGKey(0)
    k_x, k_w, k_b = jax.random.split(key, 3)

    # Small shapes consistent with the module: Linear(3, 10) forces C=3.
    N, C, H, W = 2, 3, 16, 16
    x = jax.random.normal(k_x, (N, C, H, W), dtype=jnp.float32)

    # Deterministic Linear(3, 10) params (PyTorch-style uniform(-1/sqrt(3), 1/sqrt(3))).
    bound = 1.0 / jnp.sqrt(3.0)
    weight = jax.random.uniform(k_w, (10, 3), minval=-bound, maxval=bound,
                                dtype=jnp.float32)
    bias = jax.random.uniform(k_b, (10,), minval=-bound, maxval=bound,
                              dtype=jnp.float32)

    out = evo_cnn_forward(x, weight, bias)
    out = jax.block_until_ready(out)

    # Pure-JAX reference of the ORIGINAL (unfused) math, at matching precision.
    ih = (jnp.arange(32, dtype=jnp.int32) * H) // 32
    iw = (jnp.arange(32, dtype=jnp.int32) * W) // 32
    x_up = x[:, :, ih[:, None], iw[None, :]]                       # (N, C, 32, 32)
    x_mean = jnp.mean(x_up.reshape(N, C, -1), axis=-1)             # (N, C)
    ref = jnp.dot(x_mean, weight.T,
                  precision=jax.lax.Precision.HIGHEST) + bias      # (N, 10)

    assert out.shape == (N, 10)
    assert jnp.allclose(out, ref, atol=1e-4, rtol=1e-4)

    print("KERNEL_OK")
</pallas_src>

<mosaic_0001>
module attributes {stable_mosaic.version = 11 : i64} {
  func.func @_fused_pool_linear_kernel(%arg0: i32, %arg1: memref<8x768xf32, #tpu.memory_space<vmem>>, %arg2: memref<768x128xf32, #tpu.memory_space<vmem>>, %arg3: memref<1x128xf32, #tpu.memory_space<vmem>>, %arg4: memref<8x128xf32, #tpu.memory_space<vmem>>) attributes {dimension_semantics = [#tpu.dimension_semantics<parallel>], iteration_bounds = array<i64: 1>, scalar_prefetch = 0 : i64, scratch_operands = 0 : i64, tpu.core_type = #tpu.core_type<tc>, window_params = [{transform_indices = @transform_0, window_bounds = array<i64: 8, 768>}, {pipeline_mode = #tpu.pipeline_mode<synchronous>, transform_indices = @transform_1, window_bounds = array<i64: 768, 128>}, {pipeline_mode = #tpu.pipeline_mode<synchronous>, transform_indices = @transform_2, window_bounds = array<i64: 1, 128>}, {transform_indices = @transform_3, window_bounds = array<i64: 8, 128>}]} {
    %c0 = arith.constant 0 : index
    %c0_0 = arith.constant 0 : index
    %0 = vector.load %arg1[%c0, %c0_0] : memref<8x768xf32, #tpu.memory_space<vmem>>, vector<8x768xf32>
    %c0_1 = arith.constant 0 : index
    %c0_2 = arith.constant 0 : index
    %1 = vector.load %arg2[%c0_1, %c0_2] : memref<768x128xf32, #tpu.memory_space<vmem>>, vector<768x128xf32>
    %cst = arith.constant dense<0.000000e+00> : vector<8x128xf32>
    %2 = tpu.matmul %0, %1, %cst {dimension_numbers = #tpu.dot_dimension_numbers<[1], [0], [0], [1], [0, 0, 1, 1], [], []>, precision = #tpu.contract_precision<fp32>} : vector<8x768xf32>, vector<768x128xf32>, vector<8x128xf32> -> vector<8x128xf32>
    %c0_3 = arith.constant 0 : index
    %c0_4 = arith.constant 0 : index
    %3 = vector.load %arg3[%c0_3, %c0_4] : memref<1x128xf32, #tpu.memory_space<vmem>>, vector<1x128xf32>
    %4 = vector.broadcast %3 : vector<1x128xf32> to vector<8x128xf32>
    %5 = arith.addf %2, %4 : vector<8x128xf32>
    %c0_5 = arith.constant 0 : index
    %c0_6 = arith.constant 0 : index
    %6 = vector.load %arg4[%c0_5, %c0_6] : memref<8x128xf32, #tpu.memory_space<vmem>>, vector<8x128xf32>
    tpu.vector_store %arg4[%c0_5, %c0_6], %5 {strides = array<i32>} : memref<8x128xf32, #tpu.memory_space<vmem>>, vector<8x128xf32>,
    return
  }
  func.func @transform_0(%arg0: i32) -> (i32, i32) {
    %c0_i32 = arith.constant 0 : i32
    %c0_i32_0 = arith.constant 0 : i32
    return %arg0, %c0_i32 : i32, i32
  }
  func.func @transform_1(%arg0: i32) -> (i32, i32) {
    %c0_i32 = arith.constant 0 : i32
    %c0_i32_0 = arith.constant 0 : i32
    %c0_i32_1 = arith.constant 0 : i32
    return %c0_i32, %c0_i32_0 : i32, i32
  }
  func.func @transform_2(%arg0: i32) -> (i32, i32) {
    %c0_i32 = arith.constant 0 : i32
    %c0_i32_0 = arith.constant 0 : i32
    %c0_i32_1 = arith.constant 0 : i32
    return %c0_i32, %c0_i32_0 : i32, i32
  }
  func.func @transform_3(%arg0: i32) -> (i32, i32) {
    %c0_i32 = arith.constant 0 : i32
    %c0_i32_0 = arith.constant 0 : i32
    return %arg0, %c0_i32 : i32, i32
  }
}

</mosaic_0001>

<bundles_post_ra>
// kernel: tpu_custom_call.1
= control target key start
LH: loop header
LB: loop body
LE: loop exit
PB: predicated region body
PF: predicated region fallthrough
CT: control target
= control target key end

     0   :  { %8 = vsyncpa [#allocation3], 0  ;;  %s6051_s0 = inlined_call_operand.hbm [shape: f32[2,768], index: 0, kind: input, shape index: {}]   ;;  %s6052_s1 = inlined_call_operand.hbm [shape: f32[768,128], index: 1, kind: input, shape index: {}]   ;;  %s6053_s2 = inlined_call_operand.vmem [shape: f32[1,128], index: 2, kind: input, shape index: {}]   ;;  %s6054_s3 = inlined_call_operand.hbm [shape: f32[2,128], index: 3, kind: output, shape index: {}]  }
   0x1   :  { %9 = vsyncpa [#allocation6], 0 }
   0x2   :  { %10 = vsyncpa [#allocation4], 0 }
   0x3   :  { %15 = vsyncadd [#allocation3], 576  ;;  %s4124_s12 = smov [#allocation2]   ;;  %s4052_s16 = scalar_lea.hbm %s6051_s0, 192 }
   0x4   :  { %s16_s13 = sshll.u32 %s4124_s12, 4  ;;  %p4053_p0 = scmp.ne.s32.totalorder %s6051_s0, %s4052_s16  ;;  %s17_s13 = int_to_ptr.vmem [resolvable:$true] %s16_s13 }
   0x5   :  { %p4056_p1 = scmp.lt.u32.totalorder %s4052_s16, %s6051_s0 }
   0x7   :  { %p4058_p2 = pnand %p4056_p1, %p4053_p0 }
   0x9   :  { %4061 = shalt.err (!%p4058_p2)
}
   0xa   :  { %s4062_s21 = scalar_lea.vmem %s17_s13, 192  ;;  %s4066_s22 = scalar_lea.vmem %s17_s13, 768 }
   0xb   :  { %p4063_p3 = scmp.ne.s32.totalorder %s17_s13, %s4062_s21  ;;  %p4067_p4 = scmp.lt.s32.totalorder %s17_s13, %s17_s13 }
   0xc   :  { %p4068_p5 = scmp.lt.s32.totalorder %s4066_s22, %s4062_s21 }
   0xe   :  { %p4069_p6 = por %p4068_p5, %p4067_p4 }
  0x10   :  { %p4070_p7 = pnand %p4069_p6, %p4063_p3 }
  0x12   :  { %4073 = shalt.err (!%p4070_p7)
}
  0x13   :  { %s4125_s23 = smov 192   ;;  %s4126_s24 = smov 12  }
  0x14   :  { %22 = dma.hbm_to_vmem [thread:$0]  %s6051_s0, 192, %s17_s13, [#allocation3], %s4125_s23, %s4125_s23, %s4126_s24  }
  0x15   :  { %s4127_s27 = smov [#allocation5]   ;;  %s4074_s4 = scalar_lea.hbm %s6052_s1, 12288 }
  0x16   :  { %s28_s28 = sshll.u32 %s4127_s27, 4  ;;  %p4075_p8 = scmp.ne.s32.totalorder %s6052_s1, %s4074_s4  ;;  %s29_s28 = int_to_ptr.vmem [resolvable:$true] %s28_s28 }
  0x17   :  { %p4078_p9 = scmp.lt.u32.totalorder %s4074_s4, %s6052_s1 }
  0x19   :  { %p4080_p10 = pnand %p4078_p9, %p4075_p8 }
  0x1b   :  { %4083 = shalt.err (!%p4080_p10)
}
  0x1c   :  { %s4084_s9 = scalar_lea.vmem %s29_s28, 12288  ;;  %p4089_p12 = scmp.lt.s32.totalorder %s29_s28, %s29_s28 }
  0x1d   :  { %p4085_p11 = scmp.ne.s32.totalorder %s29_s28, %s4084_s9  ;;  %p4090_p13 = scmp.lt.s32.totalorder %s4084_s9, %s4084_s9 }
  0x1f   :  { %p4091_p0 = por %p4090_p13, %p4089_p12 }
  0x21   :  { %p4092_p1 = pnand %p4091_p0, %p4085_p11 }
  0x23   :  { %4095 = shalt.err (!%p4092_p1)
}
  0x24   :  { %s4128_s0 = smov 128   ;;  %s4129_s10 = smov 8  }
  0x25   :  { %34 = dma.hbm_to_vmem [thread:$0]  %s6052_s1, 12288, %s29_s28, [#allocation6], %s4128_s0, %s4128_s0, %s4129_s10  }
  0x26   :  { %4118 = dma.done.wait [#allocation3], 768  }
  0x27   :  { %4119 = vsyncadd [#allocation3], 4294966528 }
  0x28   :  { %4120 = dma.done.wait [#allocation6], 12288  }
  0x29   :  { %4121 = vsyncadd [#allocation6], 4294955008  ;;  %v4130_v0 = vmov 1983009808   ;;  %v169_v2 = vlaneseq  ;;  %v67_v3 = vld [vmem:[#allocation5 + $0x80] sm:$0xff]  ;;  %v68_v4 = vld [vmem:[#allocation5 + $0x88] sm:$0xff] }
  0x2a   :  { %v167_v1 = vunpack.c.l.s4 %v4130_v0  ;;  %v51_v5 = vld [vmem:[#allocation5] sm:$0xff]  ;;  %v271_v8 = vand.u32 4294901760, %v67_v3  ;;  %v274_v9 = vand.u32 4294901760, %v68_v4  ;;  %v52_v10 = vld [vmem:[#allocation5 + $0x8] sm:$0xff]  ;;  %v69_v12 = vld [vmem:[#allocation5 + $0x90] sm:$0xff] }
  0x2b   :  { %v170_v7 = vshrl.u32 %v169_v2, 7  ;;  %v223_v11 = vand.u32 4294901760, %v51_v5  ;;  %v70_v13 = vld [vmem:[#allocation5 + $0x98] sm:$0xff]  ;;  %v226_v14 = vand.u32 4294901760, %v52_v10  ;;  %v277_v15 = vand.u32 4294901760, %v69_v12  ;;  %v53_v17 = vld [vmem:[#allocation5 + $0x10] sm:$0xff] }
  0x2c   :  { %v168_v6 = vunpack.c.0.s8 %v167_v1  ;;  %v280_v16 = vand.u32 4294901760, %v70_v13  ;;  %v54_v18 = vld [vmem:[#allocation5 + $0x18] sm:$0xff]  ;;  %v4178_v19 = vpack.c.bf16 %v274_v9, %v271_v8  ;;  %v229_v21 = vand.u32 4294901760, %v53_v17  ;;  %v71_v23 = vld [vmem:[#allocation5 + $0xa0] sm:$0xff]  ;;  %v72_v24 = vld [vmem:[#allocation5 + $0xa8] sm:$0xff] }
  0x2d   :  { %v4180_v20 = vsub.f32 %v51_v5, %v223_v11  ;;  %v232_v22 = vand.u32 4294901760, %v54_v18  ;;  %v4182_v25 = vpack.c.bf16 %v226_v14, %v223_v11  ;;  %v4184_v26 = vsub.f32 %v52_v10, %v226_v14  ;;  %v55_v28 = vld [vmem:[#allocation5 + $0x20] sm:$0xff]  ;;  %v56_v29 = vld [vmem:[#allocation5 + $0x28] sm:$0xff]  ;;  %v73_v43 = vld [vmem:[#allocation5 + $0xb0] sm:$0xff] }
  0x2e   :  { %v4186_v27 = vpack.c.bf16 %v280_v16, %v277_v15  ;;  %v4188_v30 = vsub.s32 %v168_v6, %v170_v7  ;;  %3459 = vmatprep.subr.bf16.mxu0 %v4178_v19  ;;  %v4191_v31 = vsub.f32 %v69_v12, %v277_v15  ;;  %v4193_v32 = vsub.f32 %v70_v13, %v280_v16  ;;  %v74_v48 = vld [vmem:[#allocation5 + $0xb8] sm:$0xff]  ;;  %v57_v57 = vld [vmem:[#allocation5 + $0x30] sm:$0xff]  ;;  %v75_v11 = vld [vmem:[#allocation5 + $0xc0] sm:$0xff] }
  0x2f   :  { %v4195_v33 = vpack.c.bf16 %v232_v22, %v229_v21  ;;  %v4197_v34 = vsub.f32 %v53_v17, %v229_v21  ;;  %3461 = vmatpush3.bf16.msra.mxu0 %v4182_v25  ;;  %v283_v35 = vand.u32 4294901760, %v71_v23  ;;  %v286_v36 = vand.u32 4294901760, %v72_v24  ;;  %v58_v58 = vld [vmem:[#allocation5 + $0x38] sm:$0xff]  ;;  %v76_v12 = vld [vmem:[#allocation5 + $0xc8] sm:$0xff]  ;;  %v59_v17 = vld [vmem:[#allocation5 + $0x40] sm:$0xff] }
  0x30   :  { %6220 = vst [vmem:[#allocation11_spill] sm:$0xff] %v4188_v30  ;;  %v4200_v37 = vsub.f32 %v67_v3, %v271_v8  ;;  %v4202_v38 = vsub.f32 %v68_v4, %v274_v9  ;;  %3463 = vmatprep.subr.bf16.mxu0 %v4186_v27  ;;  %v235_v39 = vand.u32 4294901760, %v55_v28  ;;  %v238_v40 = vand.u32 4294901760, %v56_v29 }
  0x31   :  { %v6070_v41 = vand.u32 4294901760, %v4180_v20  ;;  %v6068_v42 = vand.u32 4294901760, %v4184_v26  ;;  %v4207_v44 = vsub.f32 %v54_v18, %v232_v22  ;;  %v4209_v45 = vpack.c.bf16 %v286_v36, %v283_v35 }
  0x32   :  { %v4211_v46 = vsub.f32 %v71_v23, %v283_v35  ;;  %v6073_v47 = vand.u32 4294901760, %v4200_v37  ;;  %v4214_v49 = vsub.f32 %v72_v24, %v286_v36  ;;  %v6071_v50 = vand.u32 4294901760, %v4202_v38  ;;  %v60_v36 = vld [vmem:[#allocation5 + $0x48] sm:$0xff] }
  0x33   :  { %v4217_v51 = vpack.c.bf16 %v238_v40, %v235_v39  ;;  %v4219_v52 = vsub.f32 %v55_v28, %v235_v39  ;;  %3465 = vmatpush3.bf16.msra.mxu0 %v4195_v33  ;;  %v338_v54 = vsub.f32 %v4180_v20, %v6070_v41  ;;  %v345_v55 = vsub.f32 %v4184_v26, %v6068_v42 }
  0x34   :  { %v450_v53 = vsub.f32 %v4200_v37, %v6073_v47  ;;  %v289_v56 = vand.u32 4294901760, %v73_v43  ;;  %3467 = vmatprep.subr.bf16.mxu0 %v4209_v45  ;;  %v457_v59 = vsub.f32 %v4202_v38, %v6071_v50  ;;  %v292_v60 = vand.u32 4294901760, %v74_v48  ;;  %v4044_v47 = vld [vmem:[#allocation2] ss:$12 sps:$4 sm:$0xff]  }
  0x35   :  { %v6066_v61 = vand.u32 4294901760, %v4191_v31  ;;  %v6065_v62 = vand.u32 4294901760, %v4193_v32  ;;  %v4237_v0 = vsub.f32 %v56_v29, %v238_v40  ;;  %v339_v1 = vand.u32 4294901760, %v338_v54 }
  0x36   :  { %v451_v63 = vand.u32 4294901760, %v450_v53  ;;  %v346_v2 = vand.u32 4294901760, %v345_v55  ;;  %v458_v3 = vand.u32 4294901760, %v457_v59  ;;  %v4239_v4 = vpack.c.bf16 %v292_v60, %v289_v56 }
  0x37   :  { %v4241_v5 = vsub.f32 %v73_v43, %v289_v56  ;;  %v464_v6 = vsub.f32 %v4191_v31, %v6066_v61  ;;  %3469 = vmatpush3.bf16.msra.mxu0 %v4217_v51  ;;  %v471_v8 = vsub.f32 %v4193_v32, %v6065_v62  ;;  %v241_v9 = vand.u32 4294901760, %v57_v57  ;;  %v81_v62 = vld [vmem:[#allocation5 + $0xf0] sm:$0xff]  ;;  %v82_v61 = vld [vmem:[#allocation5 + $0xf8] sm:$0xff] }
  0x38   :  { %v3492_v7 = vpack.c.bf16 %v346_v2, %v339_v1  ;;  %v244_v10 = vand.u32 4294901760, %v58_v58  ;;  %v3490_v13 = vpack.c.bf16 %v458_v3, %v451_v63  ;;  %3471 = vmatprep.subr.bf16.mxu0 %v4239_v4  ;;  %v6063_v15 = vand.u32 4294901760, %v4197_v34  ;;  %v77_v1 = vld [vmem:[#allocation5 + $0xd0] sm:$0xff]  ;;  %v78_v2 = vld [vmem:[#allocation5 + $0xd8] sm:$0xff] }
  0x39   :  { %v465_v14 = vand.u32 4294901760, %v464_v6  ;;  %v6061_v16 = vand.u32 4294901760, %v4207_v44  ;;  %v4253_v18 = vsub.f32 %v74_v48, %v292_v60  ;;  %v472_v21 = vand.u32 4294901760, %v471_v8  ;;  %v61_v8 = vld [vmem:[#allocation5 + $0x50] sm:$0xff] }
  0x3a   :  { %v4255_v22 = vpack.c.bf16 %v244_v10, %v241_v9  ;;  %v4257_v23 = vsub.f32 %v57_v57, %v241_v9  ;;  %3491 = vmatprep.subr.bf16.mxu1 %v3490_v13  ;;  %v352_v24 = vsub.f32 %v4197_v34, %v6063_v15  ;;  %v295_v29 = vand.u32 4294901760, %v75_v11 }
  0x3b   :  { %v359_v28 = vsub.f32 %v4207_v44, %v6061_v16  ;;  %v298_v35 = vand.u32 4294901760, %v76_v12  ;;  %3493 = vmatpush3.bf16.msra.mxu1 %v3492_v7  ;;  %v3494_v39 = vpack.c.bf16 %v472_v21, %v465_v14  ;;  %v6060_v40 = vand.u32 4294901760, %v4211_v46 }
  0x3c   :  { %3473 = vmatpush3.bf16.msra.mxu0 %v4255_v22  ;;  %v6057_v43 = vand.u32 4294901760, %v4214_v49  ;;  %v247_v48 = vand.u32 4294901760, %v59_v17  ;;  %v4268_v53 = vsub.f32 %v58_v58, %v244_v10  ;;  %v353_v54 = vand.u32 4294901760, %v352_v24 }
  0x3d   :  { %v360_v55 = vand.u32 4294901760, %v359_v28  ;;  %v4270_v56 = vpack.c.bf16 %v298_v35, %v295_v29  ;;  %3495 = vmatprep.subr.bf16.mxu1 %v3494_v39  ;;  %v4272_v57 = vsub.f32 %v75_v11, %v295_v29  ;;  %v478_v59 = vsub.f32 %v4211_v46, %v6060_v40  ;;  %v62_v28 = vld [vmem:[#allocation5 + $0x58] sm:$0xff] }
  0x3e   :  { %v485_v60 = vsub.f32 %v4214_v49, %v6057_v43  ;;  %v250_v63 = vand.u32 4294901760, %v60_v36  ;;  %v4281_v3 = vsub.f32 %v76_v12, %v298_v35  ;;  %v6056_v6 = vand.u32 4294901760, %v4219_v52 }
  0x3f   :  { %v3496_v58 = vpack.c.bf16 %v360_v55, %v353_v54  ;;  %3475 = vmatprep.subr.bf16.mxu0 %v4270_v56  ;;  %v6055_v7 = vand.u32 4294901760, %v4237_v0  ;;  %v479_v9 = vand.u32 4294901760, %v478_v59  ;;  %v4287_v13 = vsub.f32 %v59_v17, %v247_v48 }
  0x40   :  { %v486_v10 = vand.u32 4294901760, %v485_v60  ;;  %v4285_v11 = vpack.c.bf16 %v250_v63, %v247_v48  ;;  %v366_v14 = vsub.f32 %v4219_v52, %v6056_v6  ;;  %v301_v21 = vand.u32 4294901760, %v77_v1  ;;  %v79_v48 = vld [vmem:[#allocation5 + $0xe0] sm:$0xff]  ;;  %v80_v6 = vld [vmem:[#allocation5 + $0xe8] sm:$0xff] }
  0x41   :  { %3497 = vmatpush3.bf16.msra.mxu1 %v3496_v58  ;;  %v373_v12 = vsub.f32 %v4237_v0, %v6055_v7  ;;  %v304_v24 = vand.u32 4294901760, %v78_v2  ;;  %v6058_v35 = vand.u32 4294901760, %v4241_v5  ;;  %v6059_v17 = vand.u32 4294901760, %v4253_v18 }
  0x42   :  { %6221 = vst [vmem:[#allocation12_spill] sm:$0xff] %v4285_v11  ;;  %v3498_v29 = vpack.c.bf16 %v486_v10, %v479_v9  ;;  %3477 = vmatpush3.bf16.msra.mxu0 %v4285_v11  ;;  %v253_v39 = vand.u32 4294901760, %v61_v8  ;;  %v4298_v54 = vsub.f32 %v60_v36, %v250_v63  ;;  %v367_v55 = vand.u32 4294901760, %v366_v14  ;;  %v63_v14 = vld [vmem:[#allocation5 + $0x60] sm:$0xff] }
  0x43   :  { %v374_v59 = vand.u32 4294901760, %v373_v12  ;;  %v4300_v60 = vpack.c.bf16 %v304_v24, %v301_v21  ;;  %v4302_v58 = vsub.f32 %v77_v1, %v301_v21  ;;  %v492_v9 = vsub.f32 %v4241_v5, %v6058_v35 }
  0x44   :  { %3499 = vmatprep.subr.bf16.mxu1 %v3498_v29  ;;  %v499_v10 = vsub.f32 %v4253_v18, %v6059_v17  ;;  %v256_v7 = vand.u32 4294901760, %v62_v28  ;;  %v4311_v36 = vsub.f32 %v78_v2, %v304_v24  ;;  %v6062_v63 = vand.u32 4294901760, %v4257_v23  ;;  %v64_v17 = vld [vmem:[#allocation5 + $0x68] sm:$0xff] }
  0x45   :  { %6222 = vst [vmem:[#allocation13_spill] sm:$0xff] %v4300_v60  ;;  %v3500_v43 = vpack.c.bf16 %v374_v59, %v367_v55  ;;  %3479 = vmatprep.subr.bf16.mxu0 %v4300_v60  ;;  %v6064_v1 = vand.u32 4294901760, %v4268_v53  ;;  %v493_v12 = vand.u32 4294901760, %v492_v9  ;;  %v4317_v35 = vsub.f32 %v61_v8, %v253_v39 }
  0x46   :  { %v500_v21 = vand.u32 4294901760, %v499_v10  ;;  %v4315_v29 = vpack.c.bf16 %v256_v7, %v253_v39  ;;  %v380_v55 = vsub.f32 %v4257_v23, %v6062_v63  ;;  %v307_v24 = vand.u32 4294901760, %v79_v48 }
  0x47   :  { %3501 = vmatpush3.bf16.msra.mxu1 %v3500_v43  ;;  %v387_v2 = vsub.f32 %v4268_v53, %v6064_v1  ;;  %v310_v59 = vand.u32 4294901760, %v80_v6  ;;  %v6067_v9 = vand.u32 4294901760, %v4272_v57  ;;  %v6069_v8 = vand.u32 4294901760, %v4281_v3 }
  0x48   :  { %6223 = vst [vmem:[#allocation14_spill] sm:$0xff] %v4315_v29  ;;  %v3502_v40 = vpack.c.bf16 %v500_v21, %v493_v12  ;;  %3481 = vmatpush3.bf16.msra.mxu0 %v4315_v29  ;;  %v259_v39 = vand.u32 4294901760, %v63_v14  ;;  %v4328_v43 = vsub.f32 %v62_v28, %v256_v7  ;;  %v381_v10 = vand.u32 4294901760, %v380_v55  ;;  %v65_v55 = vld [vmem:[#allocation5 + $0x70] sm:$0xff] }
  0x49   :  { %v388_v16 = vand.u32 4294901760, %v387_v2  ;;  %v4330_v63 = vpack.c.bf16 %v310_v59, %v307_v24  ;;  %v4332_v15 = vsub.f32 %v79_v48, %v307_v24  ;;  %v506_v12 = vsub.f32 %v4272_v57, %v6067_v9 }
  0x4a   :  { %3503 = vmatprep.subr.bf16.mxu1 %v3502_v40  ;;  %v513_v21 = vsub.f32 %v4281_v3, %v6069_v8  ;;  %v262_v1 = vand.u32 4294901760, %v64_v17  ;;  %v4341_v28 = vsub.f32 %v80_v6, %v310_v59  ;;  %v6072_v40 = vand.u32 4294901760, %v4287_v13  ;;  %v66_v8 = vld [vmem:[#allocation5 + $0x78] sm:$0xff] }
  0x4b   :  { %6224 = vst [vmem:[#allocation15_spill] sm:$0xff] %v4330_v63  ;;  %v3504_v7 = vpack.c.bf16 %v388_v16, %v381_v10  ;;  %3483 = vmatprep.subr.bf16.mxu0 %v4330_v63  ;;  %v6076_v48 = vand.u32 4294901760, %v4298_v54  ;;  %v507_v2 = vand.u32 4294901760, %v506_v12  ;;  %v4347_v42 = vsub.f32 %v63_v14, %v259_v39  ;;  %v4047_v63 = vld [vmem:[#allocation2 + $0x18] ss:$12 sps:$4 sm:$0xff]  }
  0x4c   :  { %v514_v24 = vand.u32 4294901760, %v513_v21  ;;  %v4345_v9 = vpack.c.bf16 %v262_v1, %v259_v39  ;;  %v394_v16 = vsub.f32 %v4287_v13, %v6072_v40  ;;  %v313_v59 = vand.u32 4294901760, %v81_v62 }
  0x4d   :  { %3505 = vmatpush3.bf16.msra.mxu1 %v3504_v7  ;;  %v401_v6 = vsub.f32 %v4298_v54, %v6076_v48  ;;  %v316_v10 = vand.u32 4294901760, %v82_v61  ;;  %v6083_v12 = vand.u32 4294901760, %v4302_v58  ;;  %v6081_v14 = vand.u32 4294901760, %v4311_v36 }
  0x4e   :  { %6225 = vst [vmem:[#allocation16_spill] sm:$0xff] %v4345_v9  ;;  %v3506_v41 = vpack.c.bf16 %v514_v24, %v507_v2  ;;  %3485 = vmatpush3.bf16.msra.mxu0 %v4345_v9  ;;  %v265_v39 = vand.u32 4294901760, %v65_v55  ;;  %v4358_v21 = vsub.f32 %v64_v17, %v262_v1  ;;  %v395_v7 = vand.u32 4294901760, %v394_v16 }
  0x4f   :  { %v402_v50 = vand.u32 4294901760, %v401_v6  ;;  %v4360_v40 = vpack.c.bf16 %v316_v10, %v313_v59  ;;  %v4362_v48 = vsub.f32 %v81_v62, %v313_v59  ;;  %v520_v2 = vsub.f32 %v4302_v58, %v6083_v12 }
  0x50   :  { %3507 = vmatprep.subr.bf16.mxu1 %v3506_v41  ;;  %v527_v24 = vsub.f32 %v4311_v36, %v6081_v14  ;;  %v268_v9 = vand.u32 4294901760, %v66_v8  ;;  %v4371_v1 = vsub.f32 %v82_v61, %v316_v10  ;;  %v6082_v16 = vand.u32 4294901760, %v4317_v35 }
  0x51   :  { %6226 = vst [vmem:[#allocation17_spill] sm:$0xff] %v4360_v40  ;;  %6227 = vst [vmem:[#allocation18_spill] sm:$0xff] %v4362_v48  ;;  %v3508_v17 = vpack.c.bf16 %v402_v50, %v395_v7  ;;  %3487 = vmatprep.subr.bf16.mxu0 %v4360_v40  ;;  %v6084_v41 = vand.u32 4294901760, %v4328_v43  ;;  %v521_v62 = vand.u32 4294901760, %v520_v2  ;;  %v4377_v29 = vsub.f32 %v65_v55, %v265_v39 }
  0x52   :  { %6228 = vst [vmem:[#allocation19_spill] sm:$0xff] %v4371_v1  ;;  %v528_v6 = vand.u32 4294901760, %v527_v24  ;;  %v4375_v59 = vpack.c.bf16 %v268_v9, %v265_v39  ;;  %v408_v14 = vsub.f32 %v4317_v35, %v6082_v16  ;;  %v172_v61 = vrot.slane %v4044_v47, %v4188_v30 }
  0x53   :  { %3509 = vmatpush3.bf16.msra.mxu1 %v3508_v17  ;;  %v415_v50 = vsub.f32 %v4328_v43, %v6084_v41  ;;  %v186_v10 = vrot.slane %v4047_v63, %v4188_v30  ;;  %v6085_v2 = vand.u32 4294901760, %v4332_v15  ;;  %v6086_v55 = vand.u32 4294901760, %v4341_v28 }
  0x54   :  { %6229 = vst [vmem:[#allocation20_spill] sm:$0xff] %v4375_v59  ;;  %v3510_v7 = vpack.c.bf16 %v528_v6, %v521_v62  ;;  %3489 = vmatpush3.bf16.msra.mxu0 %v4375_v59  ;;  %v3522_v39 = vpack.c.bf16 %v4202_v38, %v4200_v37  ;;  %v409_v24 = vand.u32 4294901760, %v408_v14  ;;  %v6087_v62 = vand.u32 4294901760, %v4347_v42 }
  0x55   :  { %v416_v17 = vand.u32 4294901760, %v415_v50  ;;  %v195_v16 = vcombine.high %v172_v61, %v186_v10  ;;  %v194_v12 = vcombine.low %v172_v61, %v186_v10  ;;  %v534_v47 = vsub.f32 %v4332_v15, %v6085_v2 }
  0x56   :  { %3511 = vmatprep.subr.bf16.mxu1 %v3510_v7  ;;  %v541_v63 = vsub.f32 %v4341_v28, %v6086_v55  ;;  %3523 = vmatprep.subr.bf16.mxu0 %v3522_v39  ;;  %v6088_v6 = vand.u32 4294901760, %v4358_v21  ;;  %v4400_v41 = vsub.f32 %v66_v8, %v268_v9  ;;  %v422_v2 = vsub.f32 %v4347_v42, %v6087_v62 }
  0x57   :  { %v3512_v14 = vpack.c.bf16 %v416_v17, %v409_v24  ;;  %v4402_v50 = vand.u32 4294901760, %v195_v16  ;;  %v4404_v61 = vand.u32 4294901760, %v194_v12  ;;  %v535_v10 = vand.u32 4294901760, %v534_v47 }
  0x58   :  { %v542_v7 = vand.u32 4294901760, %v541_v63  ;;  %v429_v39 = vsub.f32 %v4358_v21, %v6088_v6  ;;  %v547_v8 = vand.u32 4294901760, %v4362_v48  ;;  %v554_v24 = vand.u32 4294901760, %v4371_v1 }
  0x59   :  { %6230 = vst [vmem:[#allocation21_spill] sm:$0xff] %v4402_v50  ;;  %3513 = vmatpush3.bf16.msra.mxu1 %v3512_v14  ;;  %v4413_v55 = vsub.f32 %v195_v16, %v4402_v50  ;;  %v4416_v9 = vsub.f32 %v194_v12, %v4404_v61  ;;  %559 = vmatprep.mubr.f32.mxu1 %v4402_v50  ;;  %v423_v47 = vand.u32 4294901760, %v422_v2  ;;  %v435_v30 = vand.u32 4294901760, %v4377_v29 }
  0x5a   :  { %v3514_v17 = vpack.c.bf16 %v542_v7, %v535_v10  ;;  %v430_v63 = vand.u32 4294901760, %v429_v39  ;;  %v548_v14 = vsub.f32 %v4362_v48, %v547_v8  ;;  %v555_v16 = vsub.f32 %v4371_v1, %v554_v24 }
  0x5b   :  { %v320_v62 = vand.u32 4294901760, %v4413_v55  ;;  %v6105_v6 = vand.u32 4294901760, %v4416_v9  ;;  %v442_v59 = vand.u32 4294901760, %v4400_v41  ;;  %v436_v39 = vsub.f32 %v4377_v29, %v435_v30 }
  0x5c   :  { %3515 = vmatprep.subr.bf16.mxu1 %v3514_v17  ;;  %v3516_v12 = vpack.c.bf16 %v430_v63, %v423_v47  ;;  %v549_v10 = vand.u32 4294901760, %v548_v14  ;;  %v556_v7 = vand.u32 4294901760, %v555_v16  ;;  %v3524_v47 = vpack.c.bf16 %v4184_v26, %v4180_v20 }
  0x5d   :  { %v321_v40 = vsub.f32 %v4413_v55, %v320_v62  ;;  %v327_v2 = vsub.f32 %v4416_v9, %v6105_v6  ;;  %v443_v50 = vsub.f32 %v4400_v41, %v442_v59  ;;  %v3526_v1 = vpack.c.bf16 %v4193_v32, %v4191_v31 }
  0x5e   :  { %3517 = vmatpush3.bf16.msra.mxu1 %v3516_v12  ;;  %v3518_v63 = vpack.c.bf16 %v556_v7, %v549_v10  ;;  %v437_v48 = vand.u32 4294901760, %v436_v39  ;;  %v3528_v16 = vpack.c.bf16 %v4207_v44, %v4197_v34  ;;  %v3532_v12 = vpack.c.bf16 %v4237_v0, %v4219_v52 }
  0x5f   :  { %v322_v60 = vand.u32 4294901760, %v321_v40  ;;  %v328_v17 = vand.u32 4294901760, %v327_v2  ;;  %v444_v11 = vand.u32 4294901760, %v443_v50  ;;  %v3530_v40 = vpack.c.bf16 %v4214_v49, %v4211_v46 }
  0x60   :  { %3519 = vmatprep.subr.bf16.mxu1 %v3518_v63  ;;  %v6231_v2 = vand.u32 4294901760, %v4200_v37  ;;  %v6232_v50 = vand.u32 4294901760, %v4202_v38  ;;  %v6235_v7 = vand.u32 4294901760, %v4191_v31  ;;  %v6236_v39 = vand.u32 4294901760, %v4193_v32 }
  0x61   :  { %323 = vmatprep.mubr.f32.mxu0 %v322_v60  ;;  %v3520_v14 = vpack.c.bf16 %v444_v11, %v437_v48  ;;  %v6233_v11 = vand.u32 4294901760, %v4180_v20  ;;  %v6234_v48 = vand.u32 4294901760, %v4184_v26  ;;  %v6237_v37 = vand.u32 4294901760, %v4197_v34 }
  0x62   :  { %329 = vmatmul.mubr.f32.vlgmr.msra.gmra.mrb[0].mxu0 %v328_v17  ;;  %v4448_v60 = vpack.c.bf16 %v6232_v50, %v6231_v2  ;;  %v4460_v17 = vpack.c.bf16 %v6236_v39, %v6235_v7  ;;  %v6238_v38 = vand.u32 4294901760, %v4207_v44  ;;  %v6239_v20 = vand.u32 4294901760, %v4211_v46 }
  0x63   :  { %3525 = vmatpush3.bf16.msra.mxu0 %v3524_v47  ;;  %696 = vmatprep.mubr.f32.mxu0 %v4413_v55  ;;  %v4454_v10 = vpack.c.bf16 %v6234_v48, %v6233_v11  ;;  %v6240_v26 = vand.u32 4294901760, %v4214_v49  ;;  %v6241_v31 = vand.u32 4294901760, %v4219_v52  ;;  %v6242_v32 = vand.u32 4294901760, %v4237_v0 }
  0x64   :  { %3527 = vmatprep.subr.bf16.mxu0 %v3526_v1  ;;  %3521 = vmatpush3.bf16.msra.mxu1 %v3520_v14  ;;  %v4466_v55 = vpack.c.bf16 %v6238_v38, %v6237_v37  ;;  %v6243_v34 = vand.u32 4294901760, %v4241_v5  ;;  %v6244_v44 = vand.u32 4294901760, %v4253_v18  ;;  %v6245_v46 = vand.u32 4294901760, %v4257_v23 }
  0x65   :  { %v4472_v47 = vpack.c.bf16 %v6240_v26, %v6239_v20  ;;  %3555 = vmatprep.subr.bf16.mxu1 %v4178_v19  ;;  %v4479_v1 = vpack.c.bf16 %v6242_v32, %v6241_v31  ;;  %v6246_v49 = vand.u32 4294901760, %v4268_v53  ;;  %v6247_v2 = vand.u32 4294901760, %v4272_v57 }
  0x66   :  { %v4485_v63 = vpack.c.bf16 %v6244_v44, %v6243_v34  ;;  %v6248_v52 = vand.u32 4294901760, %v4281_v3  ;;  %v6249_v0 = vand.u32 4294901760, %v4287_v13  ;;  %v6250_v11 = vand.u32 4294901760, %v4298_v54 }
  0x67   :  { %v4491_v14 = vpack.c.bf16 %v6246_v49, %v6245_v46  ;;  %v6251_v7 = vand.u32 4294901760, %v4302_v58  ;;  %v6252_v39 = vand.u32 4294901760, %v4311_v36  ;;  %v6253_v38 = vand.u32 4294901760, %v4317_v35  ;;  %3529 = vmatpush3.bf16.msra.mxu0 %v3528_v16  ;;  %561 = vmatmul.mubr.f32.vlgmr.msra.gmra.mrb[0].mxu1 %v4404_v61 }
  0x68   :  { %v4497_v50 = vpack.c.bf16 %v6248_v52, %v6247_v2  ;;  %v4503_v48 = vpack.c.bf16 %v6250_v11, %v6249_v0  ;;  %v6254_v20 = vand.u32 4294901760, %v4328_v43  ;;  %v6255_v31 = vand.u32 4294901760, %v4332_v15  ;;  %3531 = vmatprep.subr.bf16.mxu0 %v3530_v40  ;;  %3557 = vmatpush3.bf16.msra.mxu1 %v4182_v25  ;;  %v84_v40 = vld [vmem:[#allocation5 + $0x108] sm:$0xff] }
  0x69   :  { %v4509_v37 = vpack.c.bf16 %v6252_v39, %v6251_v7  ;;  %v6256_v32 = vand.u32 4294901760, %v4341_v28  ;;  %v6257_v44 = vand.u32 4294901760, %v4347_v42  ;;  %v6258_v46 = vand.u32 4294901760, %v4358_v21  ;;  %3559 = vmatprep.subr.bf16.mxu1 %v4186_v27  ;;  %803 = vmatprep.mubr.f32.mxu1 %v320_v62  ;;  %v83_v62 = vld [vmem:[#allocation5 + $0x100] sm:$0xff]  ;;  %v6264_v11 = vld [vmem:[#allocation15_spill] sm:$0xff]  ;;  %v102_v7 = vld [vmem:[#allocation5 + $0x198] sm:$0xff] }
  0x6a   :  { %v4515_v26 = vpack.c.bf16 %v6254_v20, %v6253_v38  ;;  %v4530_v2 = vpack.c.bf16 %v554_v24, %v547_v8  ;;  %v4532_v52 = vpack.c.bf16 %v442_v59, %v435_v30  ;;  %v3534_v0 = vpack.c.bf16 %v4253_v18, %v4241_v5  ;;  %v6262_v8 = vld [vmem:[#allocation13_spill] sm:$0xff] }
  0x6b   :  { %v4521_v34 = vpack.c.bf16 %v6256_v32, %v6255_v31  ;;  %v4528_v49 = vpack.c.bf16 %v6258_v46, %v6257_v44  ;;  %3533 = vmatpush3.bf16.msra.mxu0 %v3532_v12  ;;  %v3536_v16 = vpack.c.bf16 %v4268_v53, %v4257_v23  ;;  %v3538_v30 = vpack.c.bf16 %v4281_v3, %v4272_v57  ;;  %v99_v23 = vld [vmem:[#allocation5 + $0x180] sm:$0xff]  ;;  %v100_v57 = vld [vmem:[#allocation5 + $0x188] sm:$0xff]  ;;  %v101_v12 = vld [vmem:[#allocation5 + $0x190] sm:$0xff] }
  0x6c   :  { %3535 = vmatprep.subr.bf16.mxu0 %v3534_v0  ;;  %3561 = vmatpush3.bf16.msra.mxu1 %v4195_v33  ;;  %v3540_v59 = vpack.c.bf16 %v4298_v54, %v4287_v13  ;;  %v3542_v5 = vpack.c.bf16 %v4311_v36, %v4302_v58  ;;  %v3544_v18 = vpack.c.bf16 %v4328_v43, %v4317_v35  ;;  %v1133_v3 = vand.u32 4294901760, %v99_v23  ;;  %v6259_v58 = vld [vmem:[#allocation12_spill] sm:$0xff]  ;;  %v6260_v35 = vld [vmem:[#allocation18_spill] sm:$0xff]  ;;  %v6261_v36 = vld [vmem:[#allocation19_spill] sm:$0xff] }
  0x6d   :  { %3563 = vmatprep.subr.bf16.mxu1 %v4209_v45  ;;  %v3546_v53 = vpack.c.bf16 %v4341_v28, %v4332_v15  ;;  %v3548_v13 = vpack.c.bf16 %v4358_v21, %v4347_v42  ;;  %v1136_v54 = vand.u32 4294901760, %v100_v57  ;;  %v3550_v43 = vpack.c.bf16 %v6261_v36, %v6260_v35  ;;  %v6263_v21 = vld [vmem:[#allocation14_spill] sm:$0xff]  ;;  %v85_v32 = vld [vmem:[#allocation5 + $0x110] sm:$0xff]  ;;  %v6266_v0 = vld [vmem:[#allocation17_spill] sm:$0xff] }
  0x6e   :  { %v4562_v24 = vsub.f32 %v99_v23, %v1133_v3  ;;  %v3552_v15 = vpack.c.bf16 %v4400_v41, %v4377_v29  ;;  %v1085_v42 = vand.u32 4294901760, %v83_v62  ;;  %v1088_v39 = vand.u32 4294901760, %v84_v40  ;;  %v86_v29 = vld [vmem:[#allocation5 + $0x118] sm:$0xff]  ;;  %v6265_v44 = vld [vmem:[#allocation16_spill] sm:$0xff] }
  0x6f   :  { %3537 = vmatpush3.bf16.msra.mxu0 %v3536_v16  ;;  %v4566_v28 = vsub.f32 %v100_v57, %v1136_v54  ;;  %v1139_v31 = vand.u32 4294901760, %v101_v12  ;;  %v1142_v46 = vand.u32 4294901760, %v102_v7  ;;  %v4577_v16 = vld [vmem:[#allocation5 + $0x1a0] sm:$0xff]  ;;  %v6269_v57 = vld [vmem:[#allocation21_spill] sm:$0xff] }
  0x70   :  { %3539 = vmatprep.subr.bf16.mxu0 %v3538_v30  ;;  %3565 = vmatpush3.bf16.msra.mxu1 %v4217_v51  ;;  %v6103_v38 = vand.u32 4294901760, %v4562_v24  ;;  %v4571_v20 = vsub.f32 %v83_v62, %v1085_v42  ;;  %v4580_v30 = vsub.f32 %v84_v40, %v1088_v39  ;;  %v6271_v62 = vld [vmem:[#allocation20_spill] sm:$0xff]  ;;  %v4605_v40 = vpack.c.bf16 %v1088_v39, %v1085_v42  ;;  %v4634_v42 = vld [vmem:[#allocation5 + $0x138] sm:$0xff] }
  0x71   :  { %3567 = vmatprep.subr.bf16.mxu1 %v4239_v4  ;;  %v6104_v41 = vand.u32 4294901760, %v4566_v28  ;;  %v6277_v39 = vand.u32 4294901760, %v4416_v9  ;;  %6281 = vst [vmem:[#allocation22_spill] sm:$0xff] %v4634_v42 }
  0x72   :  { %v1312_v23 = vsub.f32 %v4562_v24, %v6103_v38  ;;  %6273 = vst [vmem:[#allocation14_spill] sm:$0xff] %v4605_v40  ;;  %v4610_v38 = vld [vmem:[#allocation5 + $0x1b8] sm:$0xff] }
  0x73   :  { %3541 = vmatpush3.bf16.msra.mxu0 %v3540_v59  ;;  %v1091_v59 = vand.u32 4294901760, %v85_v32  ;;  %v1319_v35 = vsub.f32 %v4566_v28, %v6104_v41  ;;  %6274 = vst [vmem:[#allocation15_spill] sm:$0xff] %v4610_v38  ;;  %v4613_v41 = vpack.c.bf16 %v1142_v46, %v1139_v31 }
  0x74   :  { %3543 = vmatprep.subr.bf16.mxu0 %v3542_v5  ;;  %3569 = vmatpush3.bf16.msra.mxu1 %v4255_v22  ;;  %v1094_v5 = vand.u32 4294901760, %v86_v29 }
  0x75   :  { %3571 = vmatprep.subr.bf16.mxu1 %v4270_v56  ;;  %6275 = vst [vmem:[#allocation16_spill] sm:$0xff] %v4613_v41 }
  0x77   :  { %3545 = vmatpush3.bf16.msra.mxu0 %v3544_v18  ;;  %v4582_v18 = vld [vmem:[#allocation5 + $0x1a8] sm:$0xff] }
  0x78   :  { %3547 = vmatprep.subr.bf16.mxu0 %v3546_v53  ;;  %3573 = vmatpush3.bf16.msra.mxu1 %v6259_v58  ;;  %v4589_v53 = vld [vmem:[#allocation5 + $0x128] sm:$0xff]  ;;  %v6106_v36 = vand.u32 4294901760, %v4582_v18 }
  0x79   :  { %3575 = vmatprep.subr.bf16.mxu1 %v6262_v8  ;;  %6268 = vst [vmem:[#allocation18_spill] sm:$0xff] %v4589_v53 }
  0x7b   :  { %3549 = vmatpush3.bf16.msra.mxu0 %v3548_v13  ;;  %v4593_v13 = vsub.f32 %v101_v12, %v1139_v31  ;;  %v6107_v12 = vand.u32 4294901760, %v4577_v16  ;;  %v6278_v31 = vand.u32 4294901760, %v4571_v20 }
  0x7c   :  { %3551 = vmatprep.subr.bf16.mxu0 %v3550_v43  ;;  %3577 = vmatpush3.bf16.msra.mxu1 %v6263_v21  ;;  %v4599_v43 = vld [vmem:[#allocation5 + $0x1b0] sm:$0xff] }
  0x7d   :  { %3579 = vmatprep.subr.bf16.mxu1 %v6264_v11  ;;  %6270 = vst [vmem:[#allocation19_spill] sm:$0xff] %v4599_v43 }
  0x7f   :  { %3553 = vmatpush3.bf16.msra.mxu0 %v3552_v15  ;;  %v4603_v15 = vpack.c.bf16 %v1136_v54, %v1133_v3  ;;  %v4618_v3 = vpack.c.bf16 %v1094_v5, %v1091_v59  ;;  %v1313_v54 = vand.u32 4294901760, %v1312_v23  ;;  %v4632_v23 = vld [vmem:[#allocation5 + $0x130] sm:$0xff] }
  0x80   :  { %3587 = vmatprep.subr.bf16.mxu0 %v4448_v60  ;;  %3581 = vmatpush3.bf16.msra.mxu1 %v6265_v44  ;;  %v4587_v60 = vld [vmem:[#allocation5 + $0x120] sm:$0xff]  ;;  %6280 = vst [vmem:[#allocation20_spill] sm:$0xff] %v4632_v23 }
  0x81   :  { %3583 = vmatprep.subr.bf16.mxu1 %v6266_v0  ;;  %6267 = vst [vmem:[#allocation12_spill] sm:$0xff] %v4587_v60  ;;  %6272 = vst [vmem:[#allocation13_spill] sm:$0xff] %v4603_v15 }
  0x82   :  { %699 = vmatmul.mubr.f32.vlgmr.msra.gmra.mrb[2].mxu0 %v4416_v9  ;;  %6276 = vst [vmem:[#allocation17_spill] sm:$0xff] %v4618_v3  ;;  %v4638_v9 = vsub.f32 %v85_v32, %v1091_v59 }
  0x83   :  { %3589 = vmatpush3.bf16.msra.mxu0 %v4454_v10  ;;  %973 = vmatprep.mubr.f32.mxu0 %v6269_v57  ;;  %v4607_v10 = vsub.f32 %v102_v7, %v1142_v46  ;;  %v6109_v7 = vand.u32 4294901760, %v4599_v43  ;;  %v4628_v46 = vsub.f32 %v4571_v20, %v6278_v31  ;;  %v4046_v31 = vld [vmem:[#allocation2 + $0x4] ss:$12 sps:$4 sm:$0xff]  }
  0x84   :  { %3591 = vmatprep.subr.bf16.mxu0 %v4460_v17  ;;  %3585 = vmatpush3.bf16.msra.mxu1 %v6271_v62 }
  0x85   :  { %3619 = vmatprep.subr.bf16.mxu1 %v4178_v19  ;;  %v1320_v19 = vand.u32 4294901760, %v1319_v35  ;;  %6279 = vst [vmem:[#allocation21_spill] sm:$0xff] %v4628_v46  ;;  %v4645_v35 = vsub.f32 %v4577_v16, %v6107_v12  ;;  %v4695_v12 = vld [vmem:[#allocation5 + $0x140] sm:$0xff]  ;;  %v4825_v46 = vld [vmem:[#allocation5 + $0x178] sm:$0xff] }
  0x86   :  { %6295 = vst [vmem:[#allocation31_spill] sm:$0xff] %v4695_v12 }
  0x87   :  { %3593 = vmatpush3.bf16.msra.mxu0 %v4466_v55  ;;  %807 = vmatmul.mubr.f32.vlgmr.msra.gmra.mrb[2].mxu1 %v6277_v39  ;;  %v4640_v55 = vsub.f32 %v86_v29, %v1094_v5  ;;  %v6284_v29 = vand.u32 4294901760, %v4589_v53  ;;  %v4665_v5 = vld [vmem:[#allocation5 + $0x1c0] sm:$0xff]  ;;  %v4679_v39 = vld [vmem:[#allocation5 + $0x1c8] sm:$0xff]  ;;  %v4682_v17 = vpack.c.bf16 %v1320_v19, %v1313_v54 }
  0x88   :  { %3595 = vmatprep.subr.bf16.mxu0 %v4472_v47  ;;  %3621 = vmatpush3.bf16.msra.mxu1 %v4182_v25  ;;  %v4653_v25 = vsub.f32 %v4582_v18, %v6106_v36  ;;  %v6282_v47 = vand.u32 4294901760, %v4587_v60  ;;  %6286 = vst [vmem:[#allocation25_spill] sm:$0xff] %v4665_v5  ;;  %v4675_v36 = vsub.f32 %v4599_v43, %v6109_v7  ;;  %6290 = vst [vmem:[#allocation28_spill] sm:$0xff] %v4679_v39 }
  0x89   :  { %3623 = vmatprep.subr.bf16.mxu1 %v4186_v27  ;;  %1077 = vmatprep.mubr.f32.mxu1 %v6269_v57  ;;  %v4663_v59 = vsub.f32 %v4589_v53, %v6284_v29  ;;  %v6287_v27 = vand.u32 4294901760, %v4580_v30  ;;  %v4049_v29 = vld [vmem:[#allocation2 + $0x1c] ss:$12 sps:$4 sm:$0xff]   ;;  %6291 = vst [vmem:[#allocation29_spill] sm:$0xff] %v4682_v17  ;;  %v6293_v7 = vand.u32 4294901760, %v4593_v13  ;;  %v6306_v43 = vand.u32 4294901760, %v4640_v55 }
  0x8a   :  { %v4658_v32 = vsub.f32 %v4587_v60, %v6282_v47  ;;  %6289 = vst [vmem:[#allocation27_spill] sm:$0xff] %v4675_v36  ;;  %v6303_v60 = vand.u32 4294901760, %v4634_v42  ;;  %v6307_v19 = vand.u32 4294901760, %v4665_v5  ;;  %v4793_v17 = vld [vmem:[#allocation5 + $0x168] sm:$0xff] }
  0x8b   :  { %6285 = vst [vmem:[#allocation24_spill] sm:$0xff] %v4663_v59  ;;  %v4670_v57 = vsub.f32 %v4580_v30, %v6287_v27  ;;  %3597 = vmatpush3.bf16.msra.mxu0 %v4479_v1  ;;  %v6292_v27 = vand.u32 4294901760, %v4610_v38  ;;  %v4693_v47 = vsub.f32 %v4593_v13, %v6293_v7  ;;  %v6296_v1 = vand.u32 4294901760, %v4607_v10  ;;  %v4709_v7 = vld [vmem:[#allocation5 + $0x1d0] sm:$0xff]  ;;  %6315 = vst [vmem:[#allocation40_spill] sm:$0xff] %v4793_v17 }
  0x8c   :  { %6283 = vst [vmem:[#allocation23_spill] sm:$0xff] %v4658_v32  ;;  %3599 = vmatprep.subr.bf16.mxu0 %v4485_v63  ;;  %3625 = vmatpush3.bf16.msra.mxu1 %v4195_v33  ;;  %6299 = vst [vmem:[#allocation34_spill] sm:$0xff] %v4709_v7  ;;  %v4733_v33 = vld [vmem:[#allocation5 + $0x1d8] sm:$0xff]  ;;  %v6305_v63 = vand.u32 4294901760, %v4638_v9 }
  0x8d   :  { %6288 = vst [vmem:[#allocation26_spill] sm:$0xff] %v4670_v57  ;;  %v4688_v3 = vsub.f32 %v4610_v38, %v6292_v27  ;;  %6294 = vst [vmem:[#allocation30_spill] sm:$0xff] %v4693_v47  ;;  %v4702_v54 = vsub.f32 %v4607_v10, %v6296_v1  ;;  %v4707_v38 = vld [vmem:[#allocation5 + $0x148] sm:$0xff]  ;;  %3627 = vmatprep.subr.bf16.mxu1 %v4209_v45  ;;  %v6302_v27 = vand.u32 4294901760, %v4632_v23  ;;  %v4791_v47 = vld [vmem:[#allocation5 + $0x160] sm:$0xff] }
  0x8e   :  { %6298 = vst [vmem:[#allocation33_spill] sm:$0xff] %v4707_v38  ;;  %v6300_v1 = vld [vmem:[#allocation11_spill] sm:$0xff]  ;;  %v4727_v45 = vsub.f32 %v4634_v42, %v6303_v60  ;;  %6314 = vst [vmem:[#allocation39_spill] sm:$0xff] %v4791_v47 }
  0x8f   :  { %6297 = vst [vmem:[#allocation32_spill] sm:$0xff] %v4702_v54  ;;  %v4716_v53 = vrot.slane %v4046_v31, %v6300_v1  ;;  %v4722_v6 = vsub.f32 %v4632_v23, %v6302_v27  ;;  %3601 = vmatpush3.bf16.msra.mxu0 %v4491_v14  ;;  %v4737_v27 = vrot.slane %v4049_v29, %v6300_v1  ;;  %v6327_v54 = vand.u32 4294901760, %v4793_v17 }
  0x90   :  { %3603 = vmatprep.subr.bf16.mxu0 %v4497_v50  ;;  %3629 = vmatpush3.bf16.msra.mxu1 %v4217_v51  ;;  %v4745_v14 = vsub.f32 %v4638_v9, %v6305_v63  ;;  %v4750_v31 = vsub.f32 %v4640_v55, %v6306_v43  ;;  %v4755_v29 = vsub.f32 %v4665_v5, %v6307_v19  ;;  %v4757_v50 = vld [vmem:[#allocation5 + $0x150] sm:$0xff]  ;;  %v6308_v51 = vand.u32 4294901760, %v4679_v39  ;;  %v4775_v19 = vld [vmem:[#allocation5 + $0x158] sm:$0xff]  ;;  %v4777_v5 = vld [vmem:[#allocation5 + $0x1e0] sm:$0xff] }
  0x91   :  { %6301 = vst [vmem:[#allocation35_spill] sm:$0xff] %v4716_v53  ;;  %6304 = vst [vmem:[#allocation36_spill] sm:$0xff] %v4737_v27  ;;  %3631 = vmatprep.subr.bf16.mxu1 %v4239_v4  ;;  %v6309_v63 = vand.u32 4294901760, %v4645_v35  ;;  %v6311_v43 = vand.u32 4294901760, %v4653_v25  ;;  %v4779_v4 = vld [vmem:[#allocation5 + $0x1e8] sm:$0xff]  ;;  %v6323_v57 = vand.u32 4294901760, %v4757_v50 }
  0x92   :  { %v4763_v60 = vsub.f32 %v4679_v39, %v6308_v51  ;;  %v197_v51 = vcombine.high %v4716_v53, %v4737_v27  ;;  %v6313_v39 = vand.u32 4294901760, %v4695_v12  ;;  %v6317_v53 = vand.u32 4294901760, %v4707_v38 }
  0x93   :  { %v4768_v1 = vsub.f32 %v4645_v35, %v6309_v63  ;;  %v4773_v42 = vsub.f32 %v4653_v25, %v6311_v43  ;;  %3605 = vmatpush3.bf16.msra.mxu0 %v4503_v48  ;;  %v4809_v43 = vld [vmem:[#allocation5 + $0x1f8] sm:$0xff] }
  0x94   :  { %v4786_v23 = vsub.f32 %v4695_v12, %v6313_v39  ;;  %v4801_v27 = vsub.f32 %v4707_v38, %v6317_v53  ;;  %v6318_v39 = vand.u32 4294901760, %v4709_v7  ;;  %v4811_v12 = vld [vmem:[#allocation5 + $0x170] sm:$0xff]  ;;  %3607 = vmatprep.subr.bf16.mxu0 %v4509_v37  ;;  %3633 = vmatpush3.bf16.msra.mxu1 %v4255_v22  ;;  %v6128_v53 = vand.u32 4294901760, %v4775_v19 }
  0x95   :  { %6310 = vst [vmem:[#allocation37_spill] sm:$0xff] %v4768_v1  ;;  %6312 = vst [vmem:[#allocation38_spill] sm:$0xff] %v4773_v42  ;;  %v4795_v42 = vld [vmem:[#allocation5 + $0x1f0] sm:$0xff]  ;;  %v4813_v1 = vand.u32 4294901760, %v197_v51  ;;  %3635 = vmatprep.subr.bf16.mxu1 %v4270_v56  ;;  %v6322_v37 = vand.u32 4294901760, %v4733_v33  ;;  %v6132_v56 = vand.u32 4294901760, %v4809_v43 }
  0x96   :  { %6316 = vst [vmem:[#allocation41_spill] sm:$0xff] %v4795_v42  ;;  %v4806_v63 = vsub.f32 %v4709_v7, %v6318_v39  ;;  %6319 = vst [vmem:[#allocation42_spill] sm:$0xff] %v4811_v12  ;;  %v4842_v7 = vsub.f32 %v4757_v50, %v6323_v57  ;;  %v4852_v39 = vsub.f32 %v4775_v19, %v6128_v53 }
  0x97   :  { %6320 = vst [vmem:[#allocation43_spill] sm:$0xff] %v4813_v1  ;;  %v4828_v22 = vsub.f32 %v197_v51, %v4813_v1  ;;  %v4833_v48 = vsub.f32 %v4733_v33, %v6322_v37  ;;  %3609 = vmatpush3.bf16.msra.mxu0 %v4515_v26  ;;  %v6324_v26 = vand.u32 4294901760, %v4777_v5  ;;  %v6326_v37 = vand.u32 4294901760, %v4791_v47 }
  0x98   :  { %3611 = vmatprep.subr.bf16.mxu0 %v4521_v34  ;;  %3637 = vmatpush3.bf16.msra.mxu1 %v6259_v58  ;;  %v6325_v34 = vand.u32 4294901760, %v4779_v4  ;;  %v6328_v51 = vand.u32 4294901760, %v4795_v42 }
  0x99   :  { %6321 = vst [vmem:[#allocation44_spill] sm:$0xff] %v4828_v22  ;;  %v4857_v57 = vsub.f32 %v4777_v5, %v6324_v26  ;;  %3639 = vmatprep.subr.bf16.mxu1 %v6262_v8  ;;  %v4870_v53 = vsub.f32 %v4791_v47, %v6326_v37  ;;  %v4875_v26 = vsub.f32 %v4793_v17, %v6327_v54  ;;  %v6329_v37 = vand.u32 4294901760, %v4811_v12 }
  0x9a   :  { %v4865_v58 = vsub.f32 %v4779_v4, %v6325_v34  ;;  %v4880_v38 = vsub.f32 %v4795_v42, %v6328_v51  ;;  %v4886_v34 = vsub.f32 %v4809_v43, %v6132_v56  ;;  %v6330_v54 = vand.u32 4294901760, %v4828_v22 }
  0x9b   :  { %v4891_v47 = vsub.f32 %v4811_v12, %v6329_v37  ;;  %3613 = vmatpush3.bf16.msra.mxu0 %v4528_v49  ;;  %v6331_v37 = vand.u32 4294901760, %v4825_v46  ;;  %v6333_v49 = vand.u32 4294901760, %v4566_v28  ;;  %v6336_v56 = vand.u32 4294901760, %v4580_v30 }
  0x9c   :  { %v1183_v17 = vsub.f32 %v4828_v22, %v6330_v54  ;;  %3615 = vmatprep.subr.bf16.mxu0 %v4530_v2  ;;  %3641 = vmatpush3.bf16.msra.mxu1 %v6263_v21  ;;  %v6332_v54 = vand.u32 4294901760, %v4562_v24  ;;  %v6341_v22 = vand.u32 4294901760, %v4638_v9  ;;  %v6342_v42 = vand.u32 4294901760, %v4640_v55 }
  0x9d   :  { %v4906_v12 = vsub.f32 %v4825_v46, %v6331_v37  ;;  %3643 = vmatprep.subr.bf16.mxu1 %v6264_v11  ;;  %v6335_v11 = vand.u32 4294901760, %v4571_v20  ;;  %v6339_v37 = vand.u32 4294901760, %v4607_v10 }
  0x9e   :  { %v1184_v8 = vand.u32 4294901760, %v1183_v17  ;;  %v4922_v51 = vpack.c.bf16 %v6333_v49, %v6332_v54  ;;  %v6338_v17 = vand.u32 4294901760, %v4593_v13  ;;  %v4941_v54 = vpack.c.bf16 %v6342_v42, %v6341_v22 }
  0x9f   :  { %3617 = vmatpush3.bf16.msra.mxu0 %v4532_v52  ;;  %v4929_v2 = vpack.c.bf16 %v6336_v56, %v6335_v11  ;;  %v6344_v52 = vand.u32 4294901760, %v4645_v35  ;;  %v6345_v49 = vand.u32 4294901760, %v4653_v25  ;;  %v6348_v11 = vand.u32 4294901760, %v4663_v59 }
  0xa0   :  { %6334 = vst [vmem:[#allocation45_spill] sm:$0xff] %v4922_v51  ;;  %v4935_v21 = vpack.c.bf16 %v6339_v37, %v6338_v17  ;;  %6343 = vst [vmem:[#allocation48_spill] sm:$0xff] %v4941_v54  ;;  %3651 = vmatprep.subr.bf16.mxu0 %v4603_v15  ;;  %3645 = vmatpush3.bf16.msra.mxu1 %v6265_v44  ;;  %v6347_v37 = vand.u32 4294901760, %v4658_v32  ;;  %v6350_v42 = vand.u32 4294901760, %v4675_v36  ;;  %v6351_v22 = vand.u32 4294901760, %v4688_v3 }
  0xa1   :  { %6337 = vst [vmem:[#allocation46_spill] sm:$0xff] %v4929_v2  ;;  %v4947_v51 = vpack.c.bf16 %v6345_v49, %v6344_v52  ;;  %v6353_v52 = vand.u32 4294901760, %v4722_v6  ;;  %v6354_v49 = vand.u32 4294901760, %v4727_v45  ;;  %3647 = vmatprep.subr.bf16.mxu1 %v6266_v0  ;;  %v6356_v44 = vand.u32 4294901760, %v4755_v29  ;;  %v6390_v2 = vld [vmem:[#allocation38_spill] sm:$0xff] }
  0xa2   :  { %6340 = vst [vmem:[#allocation47_spill] sm:$0xff] %v4935_v21  ;;  %v4956_v17 = vpack.c.bf16 %v6348_v11, %v6347_v37  ;;  %v4962_v54 = vpack.c.bf16 %v6351_v22, %v6350_v42  ;;  %v6357_v56 = vand.u32 4294901760, %v4763_v60  ;;  %v6359_v11 = vand.u32 4294901760, %v4786_v23  ;;  %975 = vmatmul.mubr.f32.vlgmr.msra.gmra.mrb[4].mxu0 %v4404_v61 }
  0xa3   :  { %6346 = vst [vmem:[#allocation49_spill] sm:$0xff] %v4947_v51  ;;  %v4968_v51 = vpack.c.bf16 %v6354_v49, %v6353_v52  ;;  %v6362_v22 = vand.u32 4294901760, %v4806_v63  ;;  %v6365_v0 = vand.u32 4294901760, %v4842_v7  ;;  %v6366_v49 = vand.u32 4294901760, %v4852_v39  ;;  %3653 = vmatpush3.bf16.msra.mxu0 %v4605_v40  ;;  %1185 = vmatprep.mubr.f32.mxu0 %v1184_v8  ;;  %v6391_v8 = vld [vmem:[#allocation29_spill] sm:$0xff] }
  0xa4   :  { %6349 = vst [vmem:[#allocation50_spill] sm:$0xff] %v4956_v17  ;;  %6352 = vst [vmem:[#allocation51_spill] sm:$0xff] %v4962_v54  ;;  %v4975_v37 = vpack.c.bf16 %v6357_v56, %v6356_v44  ;;  %v6360_v17 = vand.u32 4294901760, %v4801_v27  ;;  %v6363_v54 = vand.u32 4294901760, %v4833_v48  ;;  %v6368_v56 = vand.u32 4294901760, %v4857_v57  ;;  %3655 = vmatprep.subr.bf16.mxu0 %v4613_v41  ;;  %3649 = vmatpush3.bf16.msra.mxu1 %v6271_v62  ;;  %v6392_v41 = vld [vmem:[#allocation30_spill] sm:$0xff] }
  0xa5   :  { %6355 = vst [vmem:[#allocation52_spill] sm:$0xff] %v4968_v51  ;;  %v4993_v51 = vpack.c.bf16 %v6366_v49, %v6365_v0  ;;  %v6369_v44 = vand.u32 4294901760, %v4865_v58  ;;  %v6377_v49 = vand.u32 4294901760, %v4891_v47  ;;  %3683 = vmatprep.subr.bf16.mxu1 %v6391_v8  ;;  %v6393_v40 = vand.u32 4294901760, %v6392_v41  ;;  %v6394_v62 = vld [vmem:[#allocation32_spill] sm:$0xff]  ;;  %v6403_v8 = vld [vmem:[#allocation17_spill] sm:$0xff] }
  0xa6   :  { %6358 = vst [vmem:[#allocation53_spill] sm:$0xff] %v4975_v37  ;;  %v4981_v42 = vpack.c.bf16 %v6360_v17, %v6359_v11  ;;  %v4987_v52 = vpack.c.bf16 %v6363_v54, %v6362_v22  ;;  %v6371_v11 = vand.u32 4294901760, %v4870_v53  ;;  %v6374_v22 = vand.u32 4294901760, %v4880_v38  ;;  %v6404_v41 = vld [vmem:[#allocation19_spill] sm:$0xff] }
  0xa7   :  { %6367 = vst [vmem:[#allocation56_spill] sm:$0xff] %v4993_v51  ;;  %v5000_v17 = vpack.c.bf16 %v6369_v44, %v6368_v56  ;;  %v6378_v51 = vand.u32 4294901760, %v4906_v12  ;;  %v1215_v56 = vand.u32 4294901760, %v4745_v14  ;;  %v1222_v44 = vand.u32 4294901760, %v4750_v31  ;;  %v6385_v31 = vld [vmem:[#allocation21_spill] sm:$0xff]  ;;  %3657 = vmatpush3.bf16.msra.mxu0 %v6403_v8  ;;  %1079 = vmatmul.mubr.f32.vlgmr.msra.gmra.mrb[4].mxu1 %v4404_v61 }
  0xa8   :  { %6361 = vst [vmem:[#allocation54_spill] sm:$0xff] %v4981_v42  ;;  %6364 = vst [vmem:[#allocation55_spill] sm:$0xff] %v4987_v52  ;;  %v6372_v42 = vand.u32 4294901760, %v4875_v26  ;;  %v6375_v52 = vand.u32 4294901760, %v4886_v34  ;;  %v6395_v15 = vand.u32 4294901760, %v6394_v62  ;;  %1421 = vmatprep.mubr.f32.mxu1 %v4813_v1  ;;  %v6424_v1 = vand.u32 4294901760, %v4786_v23 }
  0xa9   :  { %6370 = vst [vmem:[#allocation57_spill] sm:$0xff] %v5000_v17  ;;  %v5018_v37 = vpack.c.bf16 %v6378_v51, %v6377_v49  ;;  %v6382_v51 = vand.u32 4294901760, %v4577_v16  ;;  %v6386_v49 = vand.u32 4294901760, %v6385_v31  ;;  %v6389_v17 = vld [vmem:[#allocation37_spill] sm:$0xff] }
  0xaa   :  { %v5006_v54 = vpack.c.bf16 %v6372_v42, %v6371_v11  ;;  %v5012_v0 = vpack.c.bf16 %v6375_v52, %v6374_v22  ;;  %v6380_v42 = vand.u32 4294901760, %v4658_v32  ;;  %v6383_v22 = vand.u32 4294901760, %v4582_v18 }
  0xab   :  { %6379 = vst [vmem:[#allocation60_spill] sm:$0xff] %v5018_v37  ;;  %v6387_v37 = vld [vmem:[#allocation26_spill] sm:$0xff]  ;;  %v1341_v21 = vand.u32 4294901760, %v6389_v17  ;;  %v3686_v16 = vpack.c.bf16 %v6395_v15, %v6393_v40  ;;  %v6396_v18 = vand.u32 4294901760, %v4675_v36  ;;  %v6405_v15 = vand.u32 4294901760, %v6404_v41  ;;  %v6406_v40 = vld [vmem:[#allocation15_spill] sm:$0xff] }
  0xac   :  { %6373 = vst [vmem:[#allocation58_spill] sm:$0xff] %v5006_v54  ;;  %6376 = vst [vmem:[#allocation59_spill] sm:$0xff] %v5012_v0  ;;  %v1228_v11 = vsub.f32 %v4658_v32, %v6380_v42  ;;  %v6381_v54 = vand.u32 4294901760, %v4663_v59  ;;  %v5035_v14 = vpack.c.bf16 %v6383_v22, %v6382_v51  ;;  %v6388_v0 = vand.u32 4294901760, %v6387_v37  ;;  %v6400_v17 = vld [vmem:[#allocation18_spill] sm:$0xff] }
  0xad   :  { %v1354_v51 = vsub.f32 %v4675_v36, %v6396_v18  ;;  %v6397_v22 = vand.u32 4294901760, %v4688_v3  ;;  %v6407_v62 = vand.u32 4294901760, %v6406_v40  ;;  %v3688_v18 = vpack.c.bf16 %v1222_v44, %v1215_v56 }
  0xae   :  { %v1235_v52 = vsub.f32 %v4663_v59, %v6381_v54  ;;  %6384 = vst [vmem:[#allocation61_spill] sm:$0xff] %v5035_v14  ;;  %v3684_v42 = vpack.c.bf16 %v6388_v0, %v6386_v49  ;;  %v1348_v54 = vand.u32 4294901760, %v6390_v2  ;;  %v6398_v0 = vld [vmem:[#allocation12_spill] sm:$0xff]  ;;  %v6401_v49 = vand.u32 4294901760, %v6400_v17  ;;  %3659 = vmatprep.subr.bf16.mxu0 %v5035_v14 }
  0xaf   :  { %v1361_v37 = vsub.f32 %v4688_v3, %v6397_v22  ;;  %v6399_v31 = vand.u32 4294901760, %v6398_v0  ;;  %v5066_v59 = vpack.c.bf16 %v6407_v62, %v6405_v15  ;;  %v1229_v36 = vand.u32 4294901760, %v1228_v11  ;;  %v6417_v62 = vld [vmem:[#allocation36_spill] sm:$0xff] }
  0xb0   :  { %v1236_v32 = vand.u32 4294901760, %v1235_v52  ;;  %3685 = vmatpush3.bf16.msra.mxu1 %v3684_v42  ;;  %v3690_v22 = vpack.c.bf16 %v1348_v54, %v1341_v21  ;;  %v6409_v0 = vand.u32 4294901760, %v4722_v6  ;;  %v6410_v17 = vand.u32 4294901760, %v4727_v45  ;;  %v6413_v21 = vld [vmem:[#allocation20_spill] sm:$0xff]  ;;  %v6415_v42 = vld [vmem:[#allocation22_spill] sm:$0xff] }
  0xb1   :  { %v5058_v2 = vpack.c.bf16 %v6401_v49, %v6399_v31  ;;  %6408 = vst [vmem:[#allocation26_spill] sm:$0xff] %v5066_v59  ;;  %3687 = vmatprep.subr.bf16.mxu1 %v3686_v16  ;;  %v1355_v49 = vand.u32 4294901760, %v1354_v51  ;;  %v1362_v41 = vand.u32 4294901760, %v1361_v37  ;;  %v6411_v15 = vand.u32 4294901760, %v4755_v29  ;;  %v6418_v16 = vld [vmem:[#allocation35_spill] sm:$0xff]  ;;  %v6419_v37 = vld [vmem:[#allocation25_spill] sm:$0xff] }
  0xb2   :  { %v1242_v31 = vsub.f32 %v4722_v6, %v6409_v0  ;;  %v1249_v61 = vsub.f32 %v4727_v45, %v6410_v17  ;;  %v6412_v44 = vand.u32 4294901760, %v4763_v60  ;;  %v6414_v52 = vand.u32 4294901760, %v6413_v21  ;;  %v6421_v17 = vld [vmem:[#allocation28_spill] sm:$0xff] }
  0xb3   :  { %6402 = vst [vmem:[#allocation21_spill] sm:$0xff] %v5058_v2  ;;  %v1368_v56 = vsub.f32 %v4755_v29, %v6411_v15  ;;  %v6416_v54 = vand.u32 4294901760, %v6415_v42  ;;  %v196_v51 = vcombine.low %v6418_v16, %v6417_v62  ;;  %3661 = vmatpush3.bf16.msra.mxu0 %v5058_v2  ;;  %v6420_v0 = vand.u32 4294901760, %v6419_v37 }
  0xb4   :  { %v1375_v11 = vsub.f32 %v4763_v60, %v6412_v44  ;;  %v6422_v15 = vand.u32 4294901760, %v6421_v17  ;;  %v3692_v44 = vpack.c.bf16 %v1236_v32, %v1229_v36  ;;  %v1256_v21 = vsub.f32 %v4786_v23, %v6424_v1  ;;  %3663 = vmatprep.subr.bf16.mxu0 %v5066_v59  ;;  %3689 = vmatpush3.bf16.msra.mxu1 %v3688_v18 }
  0xb5   :  { %v5086_v40 = vpack.c.bf16 %v6416_v54, %v6414_v52  ;;  %v6425_v42 = vand.u32 4294901760, %v4801_v27  ;;  %v1243_v54 = vand.u32 4294901760, %v1242_v31  ;;  %v1250_v62 = vand.u32 4294901760, %v1249_v61  ;;  %3691 = vmatprep.subr.bf16.mxu1 %v3690_v22 }
  0xb6   :  { %v5095_v14 = vpack.c.bf16 %v6422_v15, %v6420_v0  ;;  %v6426_v16 = vand.u32 4294901760, %v4806_v63  ;;  %v6427_v0 = vand.u32 4294901760, %v4833_v48  ;;  %v3694_v32 = vpack.c.bf16 %v1362_v41, %v1355_v49  ;;  %v6428_v15 = vld [vmem:[#allocation31_spill] sm:$0xff]  ;;  %v6435_v41 = vld [vmem:[#allocation34_spill] sm:$0xff] }
  0xb7   :  { %v1263_v52 = vsub.f32 %v4801_v27, %v6425_v42  ;;  %v1369_v1 = vand.u32 4294901760, %v1368_v56  ;;  %v1376_v17 = vand.u32 4294901760, %v1375_v11  ;;  %v6429_v2 = vand.u32 4294901760, %v6428_v15  ;;  %v6430_v42 = vld [vmem:[#allocation33_spill] sm:$0xff]  ;;  %3665 = vmatpush3.bf16.msra.mxu0 %v5086_v40 }
  0xb8   :  { %6423 = vst [vmem:[#allocation37_spill] sm:$0xff] %v5095_v14  ;;  %v1382_v37 = vsub.f32 %v4806_v63, %v6426_v16  ;;  %v1389_v36 = vsub.f32 %v4833_v48, %v6427_v0  ;;  %v6431_v8 = vand.u32 4294901760, %v6430_v42  ;;  %v5116_v18 = vand.u32 4294901760, %v196_v51  ;;  %3667 = vmatprep.subr.bf16.mxu0 %v5095_v14  ;;  %3693 = vmatpush3.bf16.msra.mxu1 %v3692_v44 }
  0xb9   :  { %v1257_v31 = vand.u32 4294901760, %v1256_v21  ;;  %v1264_v61 = vand.u32 4294901760, %v1263_v52  ;;  %v6433_v16 = vand.u32 4294901760, %v4842_v7  ;;  %v6434_v22 = vand.u32 4294901760, %v4852_v39  ;;  %3695 = vmatprep.subr.bf16.mxu1 %v3694_v32 }
  0xba   :  { %v5114_v59 = vpack.c.bf16 %v6431_v8, %v6429_v2  ;;  %6432 = vst [vmem:[#allocation38_spill] sm:$0xff] %v5116_v18  ;;  %v6436_v2 = vand.u32 4294901760, %v6435_v41  ;;  %v6437_v8 = vand.u32 4294901760, %v4733_v33  ;;  %v3696_v11 = vpack.c.bf16 %v1250_v62, %v1243_v54 }
  0xbb   :  { %v1270_v0 = vsub.f32 %v4842_v7, %v6433_v16  ;;  %v1277_v49 = vsub.f32 %v4852_v39, %v6434_v22  ;;  %v1383_v21 = vand.u32 4294901760, %v1382_v37  ;;  %v1390_v52 = vand.u32 4294901760, %v1389_v36 }
  0xbc   :  { %v5130_v56 = vpack.c.bf16 %v6437_v8, %v6436_v2  ;;  %v3698_v15 = vpack.c.bf16 %v1376_v17, %v1369_v1  ;;  %v6438_v42 = vand.u32 4294901760, %v4857_v57  ;;  %v6439_v22 = vand.u32 4294901760, %v4865_v58  ;;  %3669 = vmatpush3.bf16.msra.mxu0 %v5114_v59  ;;  %3697 = vmatpush3.bf16.msra.mxu1 %v3696_v11  ;;  %v6449_v11 = vld [vmem:[#allocation39_spill] sm:$0xff] }
  0xbd   :  { %v6440_v44 = vand.u32 4294901760, %v4757_v50  ;;  %v6441_v41 = vand.u32 4294901760, %v4775_v19  ;;  %v5145_v54 = vsub.f32 %v196_v51, %v5116_v18  ;;  %v6443_v62 = vand.u32 4294901760, %v4777_v5 }
  0xbe   :  { %v1396_v16 = vsub.f32 %v4857_v57, %v6438_v42  ;;  %v1403_v14 = vsub.f32 %v4865_v58, %v6439_v22  ;;  %v6444_v37 = vand.u32 4294901760, %v4779_v4  ;;  %v3700_v32 = vpack.c.bf16 %v1264_v61, %v1257_v31  ;;  %3671 = vmatprep.subr.bf16.mxu0 %v5130_v56  ;;  %3699 = vmatprep.subr.bf16.mxu1 %v3698_v15  ;;  %v6453_v15 = vld [vmem:[#allocation41_spill] sm:$0xff] }
  0xbf   :  { %v5142_v33 = vpack.c.bf16 %v6441_v41, %v6440_v44  ;;  %6442 = vst [vmem:[#allocation29_spill] sm:$0xff] %v5145_v54  ;;  %v1271_v1 = vand.u32 4294901760, %v1270_v0  ;;  %v1278_v17 = vand.u32 4294901760, %v1277_v49  ;;  %v3702_v50 = vpack.c.bf16 %v1390_v52, %v1383_v21  ;;  %v6451_v52 = vld [vmem:[#allocation40_spill] sm:$0xff] }
  0xc0   :  { %v5152_v36 = vpack.c.bf16 %v6444_v37, %v6443_v62  ;;  %v6445_v19 = vand.u32 4294901760, %v4870_v53  ;;  %v6446_v2 = vand.u32 4294901760, %v4875_v26  ;;  %v1397_v5 = vand.u32 4294901760, %v1396_v16  ;;  %3701 = vmatpush3.bf16.msra.mxu1 %v3700_v32  ;;  %v6458_v32 = vld [vmem:[#allocation42_spill] sm:$0xff] }
  0xc1   :  { %v1404_v4 = vand.u32 4294901760, %v1403_v14  ;;  %v6447_v42 = vand.u32 4294901760, %v4880_v38  ;;  %v6448_v61 = vand.u32 4294901760, %v4886_v34  ;;  %v6158_v49 = vand.u32 4294901760, %v5145_v54  ;;  %3673 = vmatpush3.bf16.msra.mxu0 %v5142_v33  ;;  %3703 = vmatprep.subr.bf16.mxu1 %v3702_v50 }
  0xc2   :  { %v1284_v51 = vsub.f32 %v4870_v53, %v6445_v19  ;;  %v1291_v8 = vsub.f32 %v4875_v26, %v6446_v2  ;;  %v6450_v21 = vand.u32 4294901760, %v6449_v11  ;;  %v6452_v22 = vand.u32 4294901760, %v6451_v52  ;;  %3675 = vmatprep.subr.bf16.mxu0 %v5152_v36 }
  0xc3   :  { %v1410_v31 = vsub.f32 %v4880_v38, %v6447_v42  ;;  %v1417_v0 = vsub.f32 %v4886_v34, %v6448_v61  ;;  %v6454_v14 = vand.u32 4294901760, %v6453_v15  ;;  %v6455_v16 = vand.u32 4294901760, %v4809_v43  ;;  %v5203_v15 = vld [vmem:[#allocation5 + $0x288] sm:$0xff] }
  0xc4   :  { %v5173_v44 = vpack.c.bf16 %v6452_v22, %v6450_v21  ;;  %v3704_v62 = vpack.c.bf16 %v1278_v17, %v1271_v1  ;;  %v1285_v37 = vand.u32 4294901760, %v1284_v51  ;;  %v1292_v19 = vand.u32 4294901760, %v1291_v8  ;;  %6463 = vst [vmem:[#allocation12_spill] sm:$0xff] %v5203_v15 }
  0xc5   :  { %v5179_v41 = vpack.c.bf16 %v6455_v16, %v6454_v14  ;;  %v6456_v2 = vand.u32 4294901760, %v4891_v47  ;;  %v6457_v61 = vand.u32 4294901760, %v4906_v12  ;;  %v3706_v21 = vpack.c.bf16 %v1404_v4, %v1397_v5 }
  0xc6   :  { %v1411_v52 = vand.u32 4294901760, %v1410_v31  ;;  %v1418_v43 = vand.u32 4294901760, %v1417_v0  ;;  %v1189_v1 = vsub.f32 %v5145_v54, %v6158_v49  ;;  %3677 = vmatpush3.bf16.msra.mxu0 %v5173_v44  ;;  %v6459_v17 = vand.u32 4294901760, %v6458_v32  ;;  %3705 = vmatpush3.bf16.msra.mxu1 %v3704_v62  ;;  %v5201_v0 = vld [vmem:[#allocation5 + $0x280] sm:$0xff]  ;;  %v6475_v49 = vld [vmem:[#allocation44_spill] sm:$0xff] }
  0xc7   :  { %v1298_v42 = vsub.f32 %v4891_v47, %v6456_v2  ;;  %v1305_v11 = vsub.f32 %v4906_v12, %v6457_v61  ;;  %v6460_v51 = vand.u32 4294901760, %v4825_v46  ;;  %3679 = vmatprep.subr.bf16.mxu0 %v5179_v41  ;;  %v3714_v50 = vpack.c.bf16 %v4566_v28, %v4562_v24  ;;  %6462 = vst [vmem:[#allocation32_spill] sm:$0xff] %v5201_v0  ;;  %v5209_v62 = vld [vmem:[#allocation5 + $0x200] sm:$0xff]  ;;  %v5211_v2 = vld [vmem:[#allocation5 + $0x208] sm:$0xff] }
  0xc8   :  { %v3708_v5 = vpack.c.bf16 %v1292_v19, %v1285_v37  ;;  %3707 = vmatprep.subr.bf16.mxu1 %v3706_v21  ;;  %v3710_v22 = vpack.c.bf16 %v1418_v43, %v1411_v52  ;;  %v1190_v14 = vand.u32 4294901760, %v1189_v1  ;;  %v3716_v46 = vpack.c.bf16 %v4580_v30, %v4571_v20  ;;  %6464 = vst [vmem:[#allocation18_spill] sm:$0xff] %v5209_v62  ;;  %v6466_v37 = vld [vmem:[#allocation23_spill] sm:$0xff]  ;;  %v6467_v19 = vld [vmem:[#allocation24_spill] sm:$0xff]  ;;  %v5240_v32 = vld [vmem:[#allocation5 + $0x2a0] sm:$0xff] }
  0xc9   :  { %v5196_v8 = vpack.c.bf16 %v6460_v51, %v6459_v17  ;;  %v1299_v4 = vand.u32 4294901760, %v1298_v42  ;;  %v1306_v31 = vand.u32 4294901760, %v1305_v11  ;;  %v3718_v16 = vpack.c.bf16 %v4607_v10, %v4593_v13  ;;  %6465 = vst [vmem:[#allocation19_spill] sm:$0xff] %v5211_v2  ;;  %v5221_v30 = vld [vmem:[#allocation5 + $0x290] sm:$0xff]  ;;  %v5223_v13 = vld [vmem:[#allocation5 + $0x298] sm:$0xff]  ;;  %v6471_v11 = vld [vmem:[#allocation27_spill] sm:$0xff] }
  0xca   :  { %v3720_v24 = vpack.c.bf16 %v4640_v55, %v4638_v9  ;;  %v3722_v28 = vpack.c.bf16 %v4653_v25, %v4645_v35  ;;  %v6159_v20 = vand.u32 4294901760, %v5201_v0  ;;  %6468 = vst [vmem:[#allocation15_spill] sm:$0xff] %v5221_v30  ;;  %6469 = vst [vmem:[#allocation20_spill] sm:$0xff] %v5223_v13  ;;  %v5225_v10 = vld [vmem:[#allocation5 + $0x210] sm:$0xff]  ;;  %3709 = vmatpush3.bf16.msra.mxu1 %v3708_v5  ;;  %v6160_v35 = vand.u32 4294901760, %v5203_v15  ;;  %v5232_v25 = vld [vmem:[#allocation5 + $0x218] sm:$0xff] }
  0xcb   :  { %6461 = vst [vmem:[#allocation30_spill] sm:$0xff] %v5196_v8  ;;  %3681 = vmatpush3.bf16.msra.mxu0 %v5196_v8  ;;  %6470 = vst [vmem:[#allocation22_spill] sm:$0xff] %v5225_v10  ;;  %v3712_v61 = vpack.c.bf16 %v1306_v31, %v1299_v4  ;;  %3711 = vmatprep.subr.bf16.mxu1 %v3710_v22  ;;  %v6161_v43 = vand.u32 4294901760, %v5209_v62  ;;  %v6162_v1 = vand.u32 4294901760, %v5211_v2  ;;  %v6163_v51 = vand.u32 4294901760, %v5221_v30  ;;  %v5247_v4 = vld [vmem:[#allocation5 + $0x2a8] sm:$0xff] }
  0xcc   :  { %3715 = vmatprep.subr.bf16.mxu0 %v3714_v50  ;;  %6472 = vst [vmem:[#allocation36_spill] sm:$0xff] %v5232_v25  ;;  %6473 = vst [vmem:[#allocation35_spill] sm:$0xff] %v5240_v32  ;;  %v6164_v50 = vand.u32 4294901760, %v5223_v13  ;;  %v6167_v5 = vand.u32 4294901760, %v5225_v10  ;;  %v6171_v17 = vand.u32 4294901760, %v5232_v25  ;;  %v5260_v52 = vld [vmem:[#allocation5 + $0x220] sm:$0xff]  ;;  %v5269_v22 = vsub.f32 %v5203_v15, %v6160_v35 }
  0xcd   :  { %6474 = vst [vmem:[#allocation25_spill] sm:$0xff] %v5247_v4  ;;  %6476 = vst [vmem:[#allocation28_spill] sm:$0xff] %v5260_v52  ;;  %v5272_v21 = vld [vmem:[#allocation5 + $0x228] sm:$0xff]  ;;  %v5274_v55 = vld [vmem:[#allocation5 + $0x2b0] sm:$0xff]  ;;  %v5287_v35 = vsub.f32 %v5211_v2, %v6162_v1  ;;  %v6493_v2 = vand.u32 4294901760, %v6475_v49  ;;  %v6497_v15 = vpack.c.bf16 %v6467_v19, %v6466_v37  ;;  %v6501_v37 = vpack.c.bf16 %v4688_v3, %v6471_v11 }
  0xce   :  { %1191 = vmatmul.mubr.f32.vlgmr.msra.gmra.mrb[6].mxu0 %v1190_v14  ;;  %v5257_v14 = vsub.f32 %v5201_v0, %v6159_v20  ;;  %3713 = vmatpush3.bf16.msra.mxu1 %v3712_v61  ;;  %6477 = vst [vmem:[#allocation31_spill] sm:$0xff] %v5272_v21  ;;  %6478 = vst [vmem:[#allocation33_spill] sm:$0xff] %v5274_v55  ;;  %v6479_v9 = vld [vmem:[#allocation13_spill] sm:$0xff]  ;;  %v5282_v61 = vsub.f32 %v5209_v62, %v6161_v43  ;;  %v5292_v42 = vld [vmem:[#allocation5 + $0x230] sm:$0xff] }
  0xcf   :  { %3717 = vmatpush3.bf16.msra.mxu0 %v3716_v46  ;;  %1558 = vmatprep.mubr.f32.mxu0 %v6475_v49  ;;  %v5290_v46 = vld [vmem:[#allocation5 + $0x2b8] sm:$0xff]  ;;  %6481 = vst [vmem:[#allocation39_spill] sm:$0xff] %v5292_v42  ;;  %v5302_v43 = vsub.f32 %v5223_v13, %v6164_v50  ;;  %v5307_v1 = vsub.f32 %v5225_v10, %v6167_v5  ;;  %v5321_v5 = vld [vmem:[#allocation5 + $0x2c0] sm:$0xff]  ;;  %v5323_v10 = vld [vmem:[#allocation5 + $0x2c8] sm:$0xff] }
  0xd0   :  { %3719 = vmatprep.subr.bf16.mxu0 %v3718_v16  ;;  %3747 = vmatprep.subr.bf16.mxu1 %v6479_v9  ;;  %6480 = vst [vmem:[#allocation34_spill] sm:$0xff] %v5290_v46  ;;  %v5297_v16 = vsub.f32 %v5221_v30, %v6163_v51  ;;  %v5310_v20 = vld [vmem:[#allocation5 + $0x238] sm:$0xff]  ;;  %v5316_v51 = vsub.f32 %v5232_v25, %v6171_v17  ;;  %6486 = vst [vmem:[#allocation24_spill] sm:$0xff] %v5321_v5  ;;  %v5325_v31 = vld [vmem:[#allocation5 + $0x240] sm:$0xff]  ;;  %v6496_v30 = vand.u32 4294901760, %v5260_v52 }
  0xd1   :  { %6483 = vst [vmem:[#allocation41_spill] sm:$0xff] %v5302_v43  ;;  %6484 = vst [vmem:[#allocation42_spill] sm:$0xff] %v5310_v20  ;;  %1423 = vmatmul.mubr.f32.vlgmr.msra.gmra.mrb[6].mxu1 %v5116_v18  ;;  %v6490_v18 = vand.u32 4294901760, %v5240_v32  ;;  %v6492_v25 = vld [vmem:[#allocation16_spill] sm:$0xff]  ;;  %v6503_v19 = vand.u32 4294901760, %v5290_v46  ;;  %v5394_v11 = vld [vmem:[#allocation5 + $0x258] sm:$0xff] }
  0xd2   :  { %6482 = vst [vmem:[#allocation40_spill] sm:$0xff] %v5297_v16  ;;  %6485 = vst [vmem:[#allocation23_spill] sm:$0xff] %v5316_v51  ;;  %1665 = vmatprep.mubr.f32.mxu1 %v6493_v2  ;;  %v5352_v13 = vsub.f32 %v5260_v52, %v6496_v30  ;;  %v5372_v52 = vld [vmem:[#allocation5 + $0x2d0] sm:$0xff]  ;;  %v5405_v49 = vld [vmem:[#allocation5 + $0x2e0] sm:$0xff] }
  0xd3   :  { %3721 = vmatpush3.bf16.msra.mxu0 %v3720_v24  ;;  %6487 = vst [vmem:[#allocation27_spill] sm:$0xff] %v5323_v10  ;;  %6488 = vst [vmem:[#allocation44_spill] sm:$0xff] %v5325_v31  ;;  %v6489_v24 = vld [vmem:[#allocation14_spill] sm:$0xff]  ;;  %v5331_v17 = vsub.f32 %v5240_v32, %v6490_v18  ;;  %v5347_v32 = vld [vmem:[#allocation5 + $0x248] sm:$0xff]  ;;  %v6498_v18 = vand.u32 4294901760, %v5272_v21 }
  0xd4   :  { %3723 = vmatprep.subr.bf16.mxu0 %v3722_v28  ;;  %3749 = vmatpush3.bf16.msra.mxu1 %v6489_v24  ;;  %v6494_v28 = vand.u32 4294901760, %v5247_v4  ;;  %6495 = vst [vmem:[#allocation63_spill] sm:$0xff] %v5347_v32  ;;  %v5392_v3 = vld [vmem:[#allocation5 + $0x250] sm:$0xff]  ;;  %6506 = vst [vmem:[#allocation66_spill] sm:$0xff] %v5394_v11  ;;  %v5409_v0 = vld [vmem:[#allocation5 + $0x260] sm:$0xff]  ;;  %v6520_v54 = vand.u32 4294901760, %v5347_v32 }
  0xd5   :  { %6491 = vst [vmem:[#allocation62_spill] sm:$0xff] %v5331_v17  ;;  %3751 = vmatprep.subr.bf16.mxu1 %v6492_v25  ;;  %v5363_v50 = vsub.f32 %v5272_v21, %v6498_v18  ;;  %v5381_v18 = vsub.f32 %v5290_v46, %v6503_v19  ;;  %6505 = vst [vmem:[#allocation65_spill] sm:$0xff] %v5392_v3  ;;  %v6508_v19 = vand.u32 4294901760, %v5310_v20  ;;  %v5407_v21 = vld [vmem:[#allocation5 + $0x2e8] sm:$0xff]  ;;  %v5429_v24 = vld [vmem:[#allocation5 + $0x2f0] sm:$0xff] }
  0xd6   :  { %v5342_v62 = vsub.f32 %v5247_v4, %v6494_v28  ;;  %v6500_v4 = vand.u32 4294901760, %v5274_v55  ;;  %6509 = vst [vmem:[#allocation67_spill] sm:$0xff] %v5405_v49  ;;  %6510 = vst [vmem:[#allocation68_spill] sm:$0xff] %v5407_v21  ;;  %v5427_v25 = vld [vmem:[#allocation5 + $0x268] sm:$0xff]  ;;  %v5431_v9 = vld [vmem:[#allocation5 + $0x2f8] sm:$0xff] }
  0xd7   :  { %3725 = vmatpush3.bf16.msra.mxu0 %v6497_v15  ;;  %6499 = vst [vmem:[#allocation64_spill] sm:$0xff] %v5363_v50  ;;  %v6502_v15 = vld [vmem:[#allocation17_spill] sm:$0xff]  ;;  %v5400_v46 = vsub.f32 %v5310_v20, %v6508_v19  ;;  %6511 = vst [vmem:[#allocation69_spill] sm:$0xff] %v5409_v0  ;;  %v6513_v19 = vand.u32 4294901760, %v5323_v10 }
  0xd8   :  { %v5368_v30 = vsub.f32 %v5274_v55, %v6500_v4  ;;  %3727 = vmatprep.subr.bf16.mxu0 %v6501_v37  ;;  %3753 = vmatpush3.bf16.msra.mxu1 %v6502_v15  ;;  %v6504_v4 = vand.u32 4294901760, %v5292_v42  ;;  %v5390_v55 = vld [vmem:[#allocation5 + $0x2d8] sm:$0xff]  ;;  %v6512_v15 = vand.u32 4294901760, %v5321_v5  ;;  %6515 = vst [vmem:[#allocation70_spill] sm:$0xff] %v5429_v24  ;;  %6516 = vst [vmem:[#allocation71_spill] sm:$0xff] %v5431_v9 }
  0xd9   :  { %v6507_v37 = vld [vmem:[#allocation61_spill] sm:$0xff]  ;;  %v5419_v20 = vsub.f32 %v5323_v10, %v6513_v19  ;;  %v6521_v19 = vld [vmem:[#allocation26_spill] sm:$0xff] }
  0xda   :  { %v5386_v28 = vsub.f32 %v5292_v42, %v6504_v4  ;;  %3755 = vmatprep.subr.bf16.mxu1 %v6507_v37  ;;  %v5414_v37 = vsub.f32 %v5321_v5, %v6512_v15  ;;  %v6514_v42 = vand.u32 4294901760, %v5325_v31  ;;  %v6517_v15 = vpack.c.bf16 %v4727_v45, %v4722_v6  ;;  %v6519_v8 = vld [vmem:[#allocation21_spill] sm:$0xff] }
  0xdb   :  { %v6518_v4 = vpack.c.bf16 %v4763_v60, %v4755_v29  ;;  %v5449_v6 = vsub.f32 %v5347_v32, %v6520_v54  ;;  %v5459_v5 = vld [vmem:[#allocation5 + $0x278] sm:$0xff]  ;;  %v6522_v54 = vand.u32 4294901760, %v5372_v52  ;;  %v6523_v60 = vpack.c.bf16 %v4801_v27, %v4786_v23 }
  0xdc   :  { %v5424_v2 = vsub.f32 %v5325_v31, %v6514_v42  ;;  %3729 = vmatpush3.bf16.msra.mxu0 %v6517_v15  ;;  %v5440_v31 = vld [vmem:[#allocation5 + $0x270] sm:$0xff]  ;;  %3757 = vmatpush3.bf16.msra.mxu1 %v6519_v8  ;;  %v6524_v29 = vand.u32 4294901760, %v5390_v55  ;;  %v6525_v42 = vand.u32 4294901760, %v5392_v3  ;;  %v6526_v32 = vpack.c.bf16 %v4833_v48, %v4806_v63  ;;  %v6530_v48 = vld [vmem:[#allocation37_spill] sm:$0xff] }
  0xdd   :  { %3731 = vmatprep.subr.bf16.mxu0 %v6518_v4  ;;  %3759 = vmatprep.subr.bf16.mxu1 %v6521_v19  ;;  %v5464_v45 = vsub.f32 %v5372_v52, %v6522_v54  ;;  %v6527_v23 = vand.u32 4294901760, %v5394_v11 }
  0xde   :  { %v5475_v4 = vsub.f32 %v5390_v55, %v6524_v29  ;;  %v5480_v54 = vsub.f32 %v5392_v3, %v6525_v42  ;;  %v6529_v29 = vand.u32 4294901760, %v5407_v21  ;;  %v6535_v3 = vand.u32 4294901760, %v5440_v31 }
  0xdf   :  { %v5491_v27 = vsub.f32 %v5394_v11, %v6527_v23  ;;  %v6532_v23 = vand.u32 4294901760, %v5427_v25 }
  0xe0   :  { %3733 = vmatpush3.bf16.msra.mxu0 %v6523_v60  ;;  %3761 = vmatpush3.bf16.msra.mxu1 %v5086_v40  ;;  %v6528_v60 = vand.u32 4294901760, %v5405_v49  ;;  %v5501_v10 = vsub.f32 %v5407_v21, %v6529_v29  ;;  %v6534_v29 = vand.u32 4294901760, %v5431_v9 }
  0xe1   :  { %3735 = vmatprep.subr.bf16.mxu0 %v6526_v32  ;;  %3763 = vmatprep.subr.bf16.mxu1 %v6530_v48  ;;  %v6531_v32 = vand.u32 4294901760, %v5409_v0  ;;  %v5513_v11 = vsub.f32 %v5427_v25, %v6532_v23  ;;  %v5531_v23 = vsub.f32 %v5440_v31, %v6535_v3  ;;  %v6538_v3 = vand.u32 4294901760, %v5459_v5 }
  0xe2   :  { %v5496_v42 = vsub.f32 %v5405_v49, %v6528_v60  ;;  %v6533_v60 = vand.u32 4294901760, %v5429_v24  ;;  %v5523_v63 = vsub.f32 %v5431_v9, %v6534_v29  ;;  %v6548_v9 = vpack.c.bf16 %v4875_v26, %v4870_v53 }
  0xe3   :  { %v5508_v15 = vsub.f32 %v5409_v0, %v6531_v32  ;;  %v6537_v0 = vpack.c.bf16 %v4865_v58, %v4857_v57  ;;  %v5547_v32 = vsub.f32 %v5459_v5, %v6538_v3  ;;  %v6539_v3 = vand.u32 4294901760, %v5257_v14 }
  0xe4   :  { %v5518_v49 = vsub.f32 %v5429_v24, %v6533_v60  ;;  %v6536_v60 = vpack.c.bf16 %v4852_v39, %v4842_v7  ;;  %3765 = vmatpush3.bf16.msra.mxu1 %v5114_v59  ;;  %v6540_v7 = vand.u32 4294901760, %v5269_v22  ;;  %v6543_v39 = vand.u32 4294901760, %v5287_v35 }
  0xe5   :  { %3767 = vmatprep.subr.bf16.mxu1 %v5130_v56  ;;  %v6545_v57 = vand.u32 4294901760, %v5297_v16  ;;  %v6546_v58 = vand.u32 4294901760, %v5302_v43  ;;  %v6558_v53 = vand.u32 4294901760, %v5368_v30  ;;  %v6559_v26 = vand.u32 4294901760, %v5381_v18 }
  0xe6   :  { %3737 = vmatpush3.bf16.msra.mxu0 %v6536_v60  ;;  %v5562_v29 = vpack.c.bf16 %v6540_v7, %v6539_v3  ;;  %v6542_v60 = vand.u32 4294901760, %v5282_v61  ;;  %v6550_v7 = vand.u32 4294901760, %v5316_v51 }
  0xe7   :  { %3739 = vmatprep.subr.bf16.mxu0 %v6537_v0  ;;  %v5574_v21 = vpack.c.bf16 %v6546_v58, %v6545_v57  ;;  %v6549_v0 = vand.u32 4294901760, %v5307_v1  ;;  %v6556_v57 = vand.u32 4294901760, %v5363_v50 }
  0xe8   :  { %6541 = vst [vmem:[#allocation21_spill] sm:$0xff] %v5562_v29  ;;  %v5568_v24 = vpack.c.bf16 %v6543_v39, %v6542_v60  ;;  %v6552_v29 = vand.u32 4294901760, %v5331_v17  ;;  %v6553_v39 = vand.u32 4294901760, %v5342_v62  ;;  %3769 = vmatpush3.bf16.msra.mxu1 %v5142_v33 }
  0xe9   :  { %6547 = vst [vmem:[#allocation37_spill] sm:$0xff] %v5574_v21  ;;  %v5583_v3 = vpack.c.bf16 %v6550_v7, %v6549_v0  ;;  %v6561_v0 = vpack.c.bf16 %v4886_v34, %v4880_v38  ;;  %v6562_v7 = vand.u32 4294901760, %v5386_v28  ;;  %v6569_v38 = vand.u32 4294901760, %v5449_v6  ;;  %3771 = vmatprep.subr.bf16.mxu1 %v5152_v36  ;;  %v6633_v21 = vld [vmem:[#allocation60_spill] sm:$0xff] }
  0xea   :  { %6544 = vst [vmem:[#allocation26_spill] sm:$0xff] %v5568_v24  ;;  %3741 = vmatpush3.bf16.msra.mxu0 %v6548_v9  ;;  %v5589_v60 = vpack.c.bf16 %v6553_v39, %v6552_v29  ;;  %v6555_v24 = vand.u32 4294901760, %v5352_v13  ;;  %v5601_v9 = vpack.c.bf16 %v6559_v26, %v6558_v53  ;;  %v6563_v39 = vand.u32 4294901760, %v5400_v46 }
  0xeb   :  { %6551 = vst [vmem:[#allocation72_spill] sm:$0xff] %v5583_v3  ;;  %3743 = vmatprep.subr.bf16.mxu0 %v6561_v0  ;;  %v6568_v26 = vand.u32 4294901760, %v5424_v2  ;;  %v6571_v0 = vand.u32 4294901760, %v5464_v45  ;;  %v6572_v29 = vand.u32 4294901760, %v5475_v4 }
  0xec   :  { %6554 = vst [vmem:[#allocation73_spill] sm:$0xff] %v5589_v60  ;;  %v5595_v58 = vpack.c.bf16 %v6556_v57, %v6555_v24  ;;  %6560 = vst [vmem:[#allocation75_spill] sm:$0xff] %v5601_v9  ;;  %v5612_v24 = vpack.c.bf16 %v6563_v39, %v6562_v7  ;;  %v6565_v57 = vand.u32 4294901760, %v5414_v37  ;;  %v6574_v39 = vand.u32 4294901760, %v5480_v54  ;;  %3773 = vmatpush3.bf16.msra.mxu1 %v5173_v44  ;;  %v6630_v60 = vld [vmem:[#allocation19_spill] sm:$0xff] }
  0xed   :  { %v5624_v34 = vpack.c.bf16 %v6569_v38, %v6568_v26  ;;  %v5631_v7 = vpack.c.bf16 %v6572_v29, %v6571_v0  ;;  %v6580_v38 = vand.u32 4294901760, %v5508_v15  ;;  %v6583_v29 = vand.u32 4294901760, %v5518_v49  ;;  %3775 = vmatprep.subr.bf16.mxu1 %v5179_v41 }
  0xee   :  { %6557 = vst [vmem:[#allocation74_spill] sm:$0xff] %v5595_v58  ;;  %6564 = vst [vmem:[#allocation76_spill] sm:$0xff] %v5612_v24  ;;  %v6566_v58 = vand.u32 4294901760, %v5419_v20  ;;  %v6575_v24 = vand.u32 4294901760, %v5491_v27  ;;  %v6584_v0 = vand.u32 4294901760, %v5523_v63 }
  0xef   :  { %6570 = vst [vmem:[#allocation78_spill] sm:$0xff] %v5624_v34  ;;  %6573 = vst [vmem:[#allocation79_spill] sm:$0xff] %v5631_v7  ;;  %v6581_v34 = vand.u32 4294901760, %v5513_v11 }
  0xf0   :  { %v5618_v53 = vpack.c.bf16 %v6566_v58, %v6565_v57  ;;  %v5637_v58 = vpack.c.bf16 %v6575_v24, %v6574_v39  ;;  %v6577_v57 = vand.u32 4294901760, %v5496_v42  ;;  %v5655_v7 = vpack.c.bf16 %v6584_v0, %v6583_v29  ;;  %v6593_v29 = vld [vmem:[#allocation43_spill] sm:$0xff]  ;;  %v4050_v0 = vld [vmem:[#allocation2 + $0x8] ss:$12 sps:$4 sm:$0xff]  }
  0xf1   :  { %v5649_v9 = vpack.c.bf16 %v6581_v34, %v6580_v38  ;;  %v6586_v24 = vand.u32 4294901760, %v5531_v23  ;;  %v6587_v39 = vand.u32 4294901760, %v5547_v32  ;;  %v6591_v34 = vld [vmem:[#allocation29_spill] sm:$0xff]  ;;  %v6592_v38 = vld [vmem:[#allocation46_spill] sm:$0xff] }
  0xf2   :  { %6567 = vst [vmem:[#allocation77_spill] sm:$0xff] %v5618_v53  ;;  %6576 = vst [vmem:[#allocation80_spill] sm:$0xff] %v5637_v58  ;;  %v6578_v53 = vand.u32 4294901760, %v5501_v10 }
  0xf3   :  { %6582 = vst [vmem:[#allocation82_spill] sm:$0xff] %v5649_v9  ;;  %6585 = vst [vmem:[#allocation83_spill] sm:$0xff] %v5655_v7  ;;  %v5661_v58 = vpack.c.bf16 %v6587_v39, %v6586_v24  ;;  %v4051_v7 = vld [vmem:[#allocation2 + $0x20] ss:$12 sps:$4 sm:$0xff]   ;;  %v6594_v24 = vld [vmem:[#allocation47_spill] sm:$0xff] }
  0xf4   :  { %v5643_v26 = vpack.c.bf16 %v6578_v53, %v6577_v57  ;;  %v6589_v53 = vpack.c.bf16 %v4906_v12, %v4891_v47  ;;  %v6590_v57 = vld [vmem:[#allocation45_spill] sm:$0xff]  ;;  %v6595_v39 = vld [vmem:[#allocation30_spill] sm:$0xff]  ;;  %v6597_v47 = vld [vmem:[#allocation48_spill] sm:$0xff] }
  0xf5   :  { %6588 = vst [vmem:[#allocation84_spill] sm:$0xff] %v5661_v58  ;;  %3777 = vmatpush3.bf16.msra.mxu1 %v6595_v39  ;;  %v6596_v12 = vld [vmem:[#allocation13_spill] sm:$0xff] }
  0xf6   :  { %6579 = vst [vmem:[#allocation81_spill] sm:$0xff] %v5643_v26  ;;  %3745 = vmatpush3.bf16.msra.mxu0 %v6589_v53  ;;  %3811 = vmatprep.subr.bf16.mxu1 %v6596_v12  ;;  %v6598_v53 = vand.u32 4294901760, %v6591_v34  ;;  %v6600_v9 = vld [vmem:[#allocation49_spill] sm:$0xff]  ;;  %v6601_v26 = vld [vmem:[#allocation14_spill] sm:$0xff] }
  0xf7   :  { %3779 = vmatprep.subr.bf16.mxu0 %v6590_v57  ;;  %v6599_v57 = vld [vmem:[#allocation11_spill] sm:$0xff]  ;;  %v6603_v12 = vld [vmem:[#allocation50_spill] sm:$0xff] }
  0xf8   :  { %1669 = vmatmul.mubr.f32.vlgmr.msra.gmra.mrb[8].mxu1 %v6598_v53  ;;  %v5679_v58 = vrot.slane %v4050_v0, %v6599_v57  ;;  %v6605_v0 = vld [vmem:[#allocation17_spill] sm:$0xff] }
  0xf9   :  { %1561 = vmatmul.mubr.f32.vlgmr.msra.gmra.mrb[8].mxu0 %v6591_v34  ;;  %3813 = vmatpush3.bf16.msra.mxu1 %v6601_v26  ;;  %v6606_v53 = vld [vmem:[#allocation61_spill] sm:$0xff] }
  0xfa   :  { %3781 = vmatpush3.bf16.msra.mxu0 %v6592_v38  ;;  %1835 = vmatprep.mubr.f32.mxu0 %v6593_v29  ;;  %v5682_v38 = vrot.slane %v4051_v7, %v6599_v57  ;;  %v6607_v7 = vld [vmem:[#allocation52_spill] sm:$0xff]  ;;  %v6609_v26 = vld [vmem:[#allocation53_spill] sm:$0xff] }
  0xfb   :  { %3783 = vmatprep.subr.bf16.mxu0 %v6594_v24  ;;  %v6602_v24 = vld [vmem:[#allocation16_spill] sm:$0xff]  ;;  %1939 = vmatprep.mubr.f32.mxu1 %v6593_v29  ;;  %v6610_v29 = vld [vmem:[#allocation54_spill] sm:$0xff] }
  0xfc   :  { %3815 = vmatprep.subr.bf16.mxu1 %v6602_v24  ;;  %v215_v34 = vcombine.high %v5679_v58, %v5682_v38  ;;  %v6612_v24 = vld [vmem:[#allocation55_spill] sm:$0xff] }
  0xfd   :  { %3817 = vmatpush3.bf16.msra.mxu1 %v6605_v0  ;;  %v6614_v0 = vld [vmem:[#allocation57_spill] sm:$0xff] }
  0xfe   :  { %3785 = vmatpush3.bf16.msra.mxu0 %v6597_v47  ;;  %v6604_v47 = vld [vmem:[#allocation51_spill] sm:$0xff]  ;;  %3819 = vmatprep.subr.bf16.mxu1 %v6606_v53  ;;  %v6617_v53 = vld [vmem:[#allocation58_spill] sm:$0xff] }
  0xff   :  { %3787 = vmatprep.subr.bf16.mxu0 %v6600_v9  ;;  %v5695_v9 = vand.u32 4294901760, %v215_v34 }
 0x101   :  { %6608 = vst [vmem:[#allocation45_spill] sm:$0xff] %v5695_v9  ;;  %3821 = vmatpush3.bf16.msra.mxu1 %v6519_v8  ;;  %v5702_v57 = vsub.f32 %v215_v34, %v5695_v9  ;;  %v6615_v8 = vand.u32 4294901760, %v5257_v14  ;;  %v6616_v34 = vand.u32 4294901760, %v5269_v22 }
 0x102   :  { %3789 = vmatpush3.bf16.msra.mxu0 %v6603_v12  ;;  %3823 = vmatprep.subr.bf16.mxu1 %v6521_v19  ;;  %v6613_v12 = vld [vmem:[#allocation56_spill] sm:$0xff] }
 0x103   :  { %3791 = vmatprep.subr.bf16.mxu0 %v6604_v47  ;;  %6611 = vst [vmem:[#allocation29_spill] sm:$0xff] %v5702_v57  ;;  %v6200_v47 = vand.u32 4294901760, %v5702_v57  ;;  %v2174_v19 = vsub.f32 %v5257_v14, %v6615_v8  ;;  %v6625_v8 = vand.u32 4294901760, %v5287_v35 }
 0x105   :  { %3825 = vmatpush3.bf16.msra.mxu1 %v5086_v40  ;;  %v2181_v40 = vsub.f32 %v5269_v22, %v6616_v34  ;;  %v2069_v34 = vsub.f32 %v5287_v35, %v6625_v8  ;;  %v6634_v8 = vld [vmem:[#allocation15_spill] sm:$0xff] }
 0x106   :  { %3793 = vmatpush3.bf16.msra.mxu0 %v6607_v7  ;;  %3827 = vmatprep.subr.bf16.mxu1 %v6530_v48  ;;  %v2045_v48 = vsub.f32 %v5702_v57, %v6200_v47  ;;  %v6618_v7 = vld [vmem:[#allocation59_spill] sm:$0xff] }
 0x107   :  { %3795 = vmatprep.subr.bf16.mxu0 %v6609_v26  ;;  %v6621_v26 = vld [vmem:[#allocation12_spill] sm:$0xff] }
 0x109   :  { %3829 = vmatpush3.bf16.msra.mxu1 %v5114_v59  ;;  %v6619_v59 = vld [vmem:[#allocation32_spill] sm:$0xff] }
 0x10a   :  { %3797 = vmatpush3.bf16.msra.mxu0 %v6610_v29  ;;  %3831 = vmatprep.subr.bf16.mxu1 %v5130_v56  ;;  %v6620_v56 = vand.u32 4294901760, %v6619_v59  ;;  %v6622_v29 = vand.u32 4294901760, %v6621_v26  ;;  %v6627_v26 = vand.u32 4294901760, %v5302_v43 }
 0x10b   :  { %3799 = vmatprep.subr.bf16.mxu0 %v6612_v24 }
 0x10c   :  { %v5728_v24 = vpack.c.bf16 %v6622_v29, %v6620_v56  ;;  %v2195_v56 = vsub.f32 %v5302_v43, %v6627_v26  ;;  %v6628_v29 = vld [vmem:[#allocation18_spill] sm:$0xff]  ;;  %v6640_v26 = vand.u32 4294901760, %v5316_v51  ;;  %v2046_v43 = vand.u32 4294901760, %v2045_v48 }
 0x10d   :  { %3833 = vmatpush3.bf16.msra.mxu1 %v5142_v33  ;;  %v6626_v33 = vand.u32 4294901760, %v5297_v16  ;;  %v6629_v47 = vand.u32 4294901760, %v6628_v29  ;;  %v6643_v48 = vld [vmem:[#allocation38_spill] sm:$0xff] }
 0x10e   :  { %3801 = vmatpush3.bf16.msra.mxu0 %v6613_v12  ;;  %6623 = vst [vmem:[#allocation46_spill] sm:$0xff] %v5728_v24  ;;  %v6624_v12 = vand.u32 4294901760, %v5282_v61  ;;  %3835 = vmatprep.subr.bf16.mxu1 %v5152_v36  ;;  %v6635_v36 = vand.u32 4294901760, %v6634_v8  ;;  %v2083_v29 = vsub.f32 %v5316_v51, %v6640_v26  ;;  %v6642_v8 = vand.u32 4294901760, %v5342_v62  ;;  %v6644_v26 = vld [vmem:[#allocation22_spill] sm:$0xff] }
 0x10f   :  { %3803 = vmatprep.subr.bf16.mxu0 %v6614_v0  ;;  %v2188_v59 = vsub.f32 %v5297_v16, %v6626_v33  ;;  %v6639_v33 = vand.u32 4294901760, %v5307_v1  ;;  %v6648_v51 = vand.u32 4294901760, %v5352_v13 }
 0x110   :  { %v2062_v0 = vsub.f32 %v5282_v61, %v6624_v12  ;;  %v6631_v12 = vand.u32 4294901760, %v6630_v60  ;;  %v2070_v60 = vand.u32 4294901760, %v2069_v34 }
 0x111   :  { %v2076_v16 = vsub.f32 %v5307_v1, %v6639_v33  ;;  %3837 = vmatpush3.bf16.msra.mxu1 %v5173_v44  ;;  %v2196_v33 = vand.u32 4294901760, %v2195_v56  ;;  %v6646_v44 = vld [vmem:[#allocation36_spill] sm:$0xff] }
 0x112   :  { %3805 = vmatpush3.bf16.msra.mxu0 %v6617_v53  ;;  %v2175_v53 = vand.u32 4294901760, %v2174_v19  ;;  %v5747_v3 = vpack.c.bf16 %v6631_v12, %v6629_v47  ;;  %v6636_v19 = vld [vmem:[#allocation20_spill] sm:$0xff]  ;;  %v6641_v47 = vand.u32 4294901760, %v5331_v17  ;;  %3839 = vmatprep.subr.bf16.mxu1 %v5179_v41  ;;  %v6649_v41 = vand.u32 4294901760, %v5363_v50 }
 0x113   :  { %3807 = vmatprep.subr.bf16.mxu0 %v6618_v7  ;;  %v2182_v7 = vand.u32 4294901760, %v2181_v40  ;;  %v6637_v40 = vand.u32 4294901760, %v6636_v19 }
 0x114   :  { %6632 = vst [vmem:[#allocation43_spill] sm:$0xff] %v5747_v3  ;;  %v2202_v12 = vsub.f32 %v5331_v17, %v6641_v47  ;;  %v2077_v47 = vand.u32 4294901760, %v2076_v16  ;;  %v2084_v17 = vand.u32 4294901760, %v2083_v29 }
 0x115   :  { %v5754_v57 = vpack.c.bf16 %v6637_v40, %v6635_v36  ;;  %v2209_v36 = vsub.f32 %v5342_v62, %v6642_v8  ;;  %v3874_v19 = vpack.c.bf16 %v2182_v7, %v2175_v53  ;;  %v2189_v40 = vand.u32 4294901760, %v2188_v59  ;;  %3841 = vmatpush3.bf16.msra.mxu1 %v6595_v39  ;;  %v6650_v7 = vld [vmem:[#allocation35_spill] sm:$0xff]  ;;  %v6652_v59 = vld [vmem:[#allocation25_spill] sm:$0xff]  ;;  %v6656_v39 = vld [vmem:[#allocation28_spill] sm:$0xff] }
 0x116   :  { %3809 = vmatpush3.bf16.msra.mxu0 %v6633_v21  ;;  %v2063_v21 = vand.u32 4294901760, %v2062_v0  ;;  %v6647_v0 = vand.u32 4294901760, %v6646_v44  ;;  %v2090_v8 = vsub.f32 %v5352_v13, %v6648_v51  ;;  %v2097_v53 = vsub.f32 %v5363_v50, %v6649_v41 }
 0x117   :  { %6638 = vst [vmem:[#allocation47_spill] sm:$0xff] %v5754_v57  ;;  %3843 = vmatprep.subr.bf16.mxu0 %v5728_v24  ;;  %v6645_v24 = vand.u32 4294901760, %v6644_v26  ;;  %v6653_v56 = vand.u32 4294901760, %v6652_v59  ;;  %v2203_v29 = vand.u32 4294901760, %v2202_v12  ;;  %v2210_v44 = vand.u32 4294901760, %v2209_v36  ;;  %3875 = vmatprep.subr.bf16.mxu1 %v3874_v19  ;;  %v6662_v12 = vld [vmem:[#allocation34_spill] sm:$0xff] }
 0x118   :  { %v3876_v16 = vpack.c.bf16 %v2070_v60, %v2063_v21  ;;  %v3878_v51 = vpack.c.bf16 %v2196_v33, %v2189_v40  ;;  %1941 = vmatmul.mubr.f32.vlgmr.msra.gmra.mrb[10].mxu1 %v6643_v48  ;;  %v6660_v21 = vld [vmem:[#allocation33_spill] sm:$0xff]  ;;  %v6663_v36 = vand.u32 4294901760, %v6662_v12  ;;  %v3880_v40 = vpack.c.bf16 %v2084_v17, %v2077_v47 }
 0x119   :  { %1837 = vmatmul.mubr.f32.vlgmr.msra.gmra.mrb[10].mxu0 %v6643_v48  ;;  %v5776_v34 = vpack.c.bf16 %v6647_v0, %v6645_v24  ;;  %v6651_v24 = vand.u32 4294901760, %v6650_v7  ;;  %v6654_v0 = vand.u32 4294901760, %v5368_v30  ;;  %v6658_v7 = vld [vmem:[#allocation31_spill] sm:$0xff]  ;;  %v6661_v60 = vand.u32 4294901760, %v6660_v21  ;;  %2283 = vmatprep.mubr.f32.mxu1 %v5695_v9 }
 0x11a   :  { %3845 = vmatpush3.bf16.msra.mxu0 %v5747_v3  ;;  %2047 = vmatprep.mubr.f32.mxu0 %v2046_v43  ;;  %v6655_v43 = vand.u32 4294901760, %v5381_v18  ;;  %v6657_v3 = vand.u32 4294901760, %v6656_v39  ;;  %v6659_v50 = vand.u32 4294901760, %v6658_v7  ;;  %v2091_v33 = vand.u32 4294901760, %v2090_v8 }
 0x11b   :  { %3847 = vmatprep.subr.bf16.mxu0 %v5754_v57  ;;  %v5791_v26 = vpack.c.bf16 %v6653_v56, %v6651_v24  ;;  %v2216_v41 = vsub.f32 %v5368_v30, %v6654_v0  ;;  %v5811_v19 = vpack.c.bf16 %v6663_v36, %v6661_v60  ;;  %v2098_v24 = vand.u32 4294901760, %v2097_v53  ;;  %3877 = vmatpush3.bf16.msra.mxu1 %v3876_v16  ;;  %v6668_v53 = vld [vmem:[#allocation39_spill] sm:$0xff] }
 0x11c   :  { %v2223_v57 = vsub.f32 %v5381_v18, %v6655_v43  ;;  %v5803_v59 = vpack.c.bf16 %v6659_v50, %v6657_v3  ;;  %v3882_v56 = vpack.c.bf16 %v2210_v44, %v2203_v29  ;;  %v6664_v50 = vand.u32 4294901760, %v5386_v28  ;;  %3879 = vmatprep.subr.bf16.mxu1 %v3878_v51  ;;  %v6670_v29 = vld [vmem:[#allocation42_spill] sm:$0xff]  ;;  %v6675_v60 = vld [vmem:[#allocation27_spill] sm:$0xff] }
 0x11d   :  { %v6665_v0 = vand.u32 4294901760, %v5400_v46  ;;  %v2217_v43 = vand.u32 4294901760, %v2216_v41  ;;  %v6666_v7 = vand.u32 4294901760, %v5414_v37  ;;  %v6667_v47 = vand.u32 4294901760, %v5419_v20 }
 0x11e   :  { %3849 = vmatpush3.bf16.msra.mxu0 %v5776_v34  ;;  %v2104_v3 = vsub.f32 %v5386_v28, %v6664_v50  ;;  %v2224_v39 = vand.u32 4294901760, %v2223_v57  ;;  %v6669_v16 = vand.u32 4294901760, %v6668_v53  ;;  %v6671_v44 = vand.u32 4294901760, %v6670_v29  ;;  %v6673_v57 = vld [vmem:[#allocation24_spill] sm:$0xff] }
 0x11f   :  { %3851 = vmatprep.subr.bf16.mxu0 %v5791_v26  ;;  %v2111_v48 = vsub.f32 %v5400_v46, %v6665_v0  ;;  %v2230_v17 = vsub.f32 %v5414_v37, %v6666_v7  ;;  %v2237_v8 = vsub.f32 %v5419_v20, %v6667_v47  ;;  %v214_v51 = vcombine.low %v5679_v58, %v5682_v38 }
 0x120   :  { %v5831_v21 = vpack.c.bf16 %v6671_v44, %v6669_v16  ;;  %v6674_v41 = vand.u32 4294901760, %v6673_v57  ;;  %v6676_v12 = vand.u32 4294901760, %v6675_v60  ;;  %v3884_v50 = vpack.c.bf16 %v2098_v24, %v2091_v33  ;;  %3881 = vmatpush3.bf16.msra.mxu1 %v3880_v40  ;;  %v6682_v60 = vld [vmem:[#allocation44_spill] sm:$0xff] }
 0x121   :  { %v6678_v0 = vand.u32 4294901760, %v5424_v2  ;;  %v6679_v47 = vand.u32 4294901760, %v5449_v6  ;;  %v2105_v58 = vand.u32 4294901760, %v2104_v3  ;;  %v2112_v38 = vand.u32 4294901760, %v2111_v48  ;;  %3883 = vmatprep.subr.bf16.mxu1 %v3882_v56 }
 0x122   :  { %6672 = vst [vmem:[#allocation30_spill] sm:$0xff] %v5831_v21  ;;  %3853 = vmatpush3.bf16.msra.mxu0 %v5803_v59  ;;  %v5840_v36 = vpack.c.bf16 %v6676_v12, %v6674_v41  ;;  %v6680_v16 = vand.u32 4294901760, %v5464_v45  ;;  %v6681_v44 = vand.u32 4294901760, %v5475_v4  ;;  %v3886_v24 = vpack.c.bf16 %v2224_v39, %v2217_v43 }
 0x123   :  { %v2118_v7 = vsub.f32 %v5424_v2, %v6678_v0  ;;  %v2125_v53 = vsub.f32 %v5449_v6, %v6679_v47  ;;  %3855 = vmatprep.subr.bf16.mxu0 %v5811_v19  ;;  %v2231_v57 = vand.u32 4294901760, %v2230_v17  ;;  %v2238_v41 = vand.u32 4294901760, %v2237_v8  ;;  %v6684_v0 = vld [vmem:[#allocation63_spill] sm:$0xff] }
 0x124   :  { %6677 = vst [vmem:[#allocation13_spill] sm:$0xff] %v5840_v36  ;;  %v2244_v29 = vsub.f32 %v5464_v45, %v6680_v16  ;;  %v2251_v33 = vsub.f32 %v5475_v4, %v6681_v44  ;;  %v6683_v12 = vand.u32 4294901760, %v6682_v60  ;;  %v6685_v47 = vand.u32 4294901760, %v6684_v0  ;;  %3885 = vmatpush3.bf16.msra.mxu1 %v3884_v50  ;;  %v6692_v50 = vld [vmem:[#allocation65_spill] sm:$0xff] }
 0x125   :  { %v5861_v40 = vand.u32 4294901760, %v214_v51  ;;  %v2119_v3 = vand.u32 4294901760, %v2118_v7  ;;  %v2126_v48 = vand.u32 4294901760, %v2125_v53  ;;  %v6686_v16 = vand.u32 4294901760, %v5480_v54  ;;  %3887 = vmatprep.subr.bf16.mxu1 %v3886_v24 }
 0x126   :  { %v5859_v9 = vpack.c.bf16 %v6685_v47, %v6683_v12  ;;  %3857 = vmatpush3.bf16.msra.mxu0 %v5831_v21  ;;  %v6687_v56 = vand.u32 4294901760, %v5491_v27  ;;  %v6688_v39 = vand.u32 4294901760, %v5372_v52  ;;  %v6689_v17 = vand.u32 4294901760, %v5390_v55  ;;  %v6694_v52 = vld [vmem:[#allocation66_spill] sm:$0xff] }
 0x127   :  { %v2132_v44 = vsub.f32 %v5480_v54, %v6686_v16  ;;  %3859 = vmatprep.subr.bf16.mxu0 %v5840_v36  ;;  %v3888_v60 = vpack.c.bf16 %v2112_v38, %v2105_v58  ;;  %v2245_v7 = vand.u32 4294901760, %v2244_v29  ;;  %v2252_v53 = vand.u32 4294901760, %v2251_v33  ;;  %v6696_v38 = vld [vmem:[#allocation67_spill] sm:$0xff]  ;;  %v6698_v33 = vld [vmem:[#allocation68_spill] sm:$0xff] }
 0x128   :  { %v2139_v43 = vsub.f32 %v5491_v27, %v6687_v56  ;;  %v5875_v8 = vpack.c.bf16 %v6689_v17, %v6688_v39  ;;  %v3890_v12 = vpack.c.bf16 %v2238_v41, %v2231_v57  ;;  %v6690_v0 = vand.u32 4294901760, %v5496_v42 }
 0x129   :  { %v6691_v16 = vand.u32 4294901760, %v5501_v10  ;;  %v6693_v36 = vand.u32 4294901760, %v6692_v50  ;;  %v6695_v21 = vand.u32 4294901760, %v6694_v52  ;;  %v5890_v58 = vsub.f32 %v214_v51, %v5861_v40  ;;  %3889 = vmatpush3.bf16.msra.mxu1 %v3888_v60  ;;  %v6704_v60 = vld [vmem:[#allocation69_spill] sm:$0xff] }
 0x12a   :  { %v2258_v47 = vsub.f32 %v5496_v42, %v6690_v0  ;;  %3861 = vmatpush3.bf16.msra.mxu0 %v5859_v9  ;;  %v6697_v29 = vand.u32 4294901760, %v6696_v38  ;;  %v6699_v24 = vand.u32 4294901760, %v6698_v33  ;;  %v3892_v41 = vpack.c.bf16 %v2126_v48, %v2119_v3  ;;  %3891 = vmatprep.subr.bf16.mxu1 %v3890_v12  ;;  %v6707_v12 = vld [vmem:[#allocation70_spill] sm:$0xff] }
 0x12b   :  { %v2265_v56 = vsub.f32 %v5501_v10, %v6691_v16  ;;  %v5887_v55 = vpack.c.bf16 %v6695_v21, %v6693_v36  ;;  %v2133_v39 = vand.u32 4294901760, %v2132_v44  ;;  %v2140_v17 = vand.u32 4294901760, %v2139_v43  ;;  %3863 = vmatprep.subr.bf16.mxu0 %v5875_v8 }
 0x12c   :  { %v5897_v57 = vpack.c.bf16 %v6699_v24, %v6697_v29  ;;  %v3894_v0 = vpack.c.bf16 %v2252_v53, %v2245_v7  ;;  %v6700_v21 = vand.u32 4294901760, %v5508_v15  ;;  %v6701_v36 = vand.u32 4294901760, %v5513_v11 }
 0x12d   :  { %v2259_v50 = vand.u32 4294901760, %v2258_v47  ;;  %v2266_v52 = vand.u32 4294901760, %v2265_v56  ;;  %v6702_v38 = vand.u32 4294901760, %v5518_v49  ;;  %v6703_v48 = vand.u32 4294901760, %v5523_v63  ;;  %v6709_v56 = vld [vmem:[#allocation71_spill] sm:$0xff]  ;;  %3893 = vmatpush3.bf16.msra.mxu1 %v3892_v41 }
 0x12e   :  { %v2146_v51 = vsub.f32 %v5508_v15, %v6700_v21  ;;  %v2153_v16 = vsub.f32 %v5513_v11, %v6701_v36  ;;  %v2050_v43 = vand.u32 4294901760, %v5890_v58  ;;  %3865 = vmatpush3.bf16.msra.mxu0 %v5887_v55  ;;  %v6705_v7 = vand.u32 4294901760, %v6704_v60  ;;  %3895 = vmatprep.subr.bf16.mxu1 %v3894_v0 }
 0x12f   :  { %v2272_v3 = vsub.f32 %v5518_v49, %v6702_v38  ;;  %v2279_v44 = vsub.f32 %v5523_v63, %v6703_v48  ;;  %v6706_v53 = vand.u32 4294901760, %v5427_v25  ;;  %v6708_v47 = vand.u32 4294901760, %v6707_v12  ;;  %3867 = vmatprep.subr.bf16.mxu0 %v5897_v57 }
 0x130   :  { %v6710_v33 = vand.u32 4294901760, %v6709_v56  ;;  %v3896_v21 = vpack.c.bf16 %v2140_v17, %v2133_v39  ;;  %v2147_v36 = vand.u32 4294901760, %v2146_v51  ;;  %v2154_v38 = vand.u32 4294901760, %v2153_v16 }
 0x131   :  { %v5918_v29 = vpack.c.bf16 %v6706_v53, %v6705_v7  ;;  %v6711_v48 = vand.u32 4294901760, %v5531_v23  ;;  %v6712_v25 = vand.u32 4294901760, %v5547_v32  ;;  %v3898_v53 = vpack.c.bf16 %v2266_v52, %v2259_v50 }
 0x132   :  { %v5924_v24 = vpack.c.bf16 %v6710_v33, %v6708_v47  ;;  %v2273_v12 = vand.u32 4294901760, %v2272_v3  ;;  %v2280_v56 = vand.u32 4294901760, %v2279_v44  ;;  %v2051_v39 = vsub.f32 %v5890_v58, %v2050_v43  ;;  %3897 = vmatpush3.bf16.msra.mxu1 %v3896_v21  ;;  %v6716_v47 = vld [vmem:[#allocation41_spill] sm:$0xff] }
 0x133   :  { %v2160_v60 = vsub.f32 %v5531_v23, %v6711_v48  ;;  %v2167_v7 = vsub.f32 %v5547_v32, %v6712_v25  ;;  %3869 = vmatpush3.bf16.msra.mxu0 %v5918_v29  ;;  %v6713_v41 = vand.u32 4294901760, %v5440_v31  ;;  %v6714_v17 = vand.u32 4294901760, %v5459_v5  ;;  %3899 = vmatprep.subr.bf16.mxu1 %v3898_v53  ;;  %v6715_v5 = vld [vmem:[#allocation40_spill] sm:$0xff]  ;;  %v6722_v25 = vld [vmem:[#allocation43_spill] sm:$0xff] }
 0x134   :  { %3871 = vmatprep.subr.bf16.mxu0 %v5924_v24  ;;  %v3906_v0 = vpack.c.bf16 %v5269_v22, %v5257_v14  ;;  %v3900_v16 = vpack.c.bf16 %v2154_v38, %v2147_v36  ;;  %v3902_v3 = vpack.c.bf16 %v2280_v56, %v2273_v12  ;;  %v2052_v44 = vand.u32 4294901760, %v2051_v39  ;;  %v6717_v22 = vld [vmem:[#allocation23_spill] sm:$0xff]  ;;  %v6718_v36 = vld [vmem:[#allocation29_spill] sm:$0xff]  ;;  %v6719_v38 = vld [vmem:[#allocation62_spill] sm:$0xff] }
 0x135   :  { %v5941_v51 = vpack.c.bf16 %v6714_v17, %v6713_v41  ;;  %v2161_v50 = vand.u32 4294901760, %v2160_v60  ;;  %v2168_v52 = vand.u32 4294901760, %v2167_v7  ;;  %v3908_v31 = vpack.c.bf16 %v5287_v35, %v5282_v61  ;;  %v6720_v35 = vld [vmem:[#allocation46_spill] sm:$0xff]  ;;  %v6721_v61 = vld [vmem:[#allocation64_spill] sm:$0xff]  ;;  %v6723_v7 = vld [vmem:[#allocation47_spill] sm:$0xff] }
 0x136   :  { %3901 = vmatpush3.bf16.msra.mxu1 %v3900_v16  ;;  %v3910_v33 = vpack.c.bf16 %v6716_v47, %v6715_v5  ;;  %v3912_v14 = vpack.c.bf16 %v6717_v22, %v5307_v1  ;;  %v3914_v48 = vpack.c.bf16 %v5342_v62, %v6719_v38  ;;  %v3916_v60 = vpack.c.bf16 %v6721_v61, %v5352_v13  ;;  %v6727_v39 = vld [vmem:[#allocation21_spill] sm:$0xff]  ;;  %v6733_v17 = vld [vmem:[#allocation74_spill] sm:$0xff]  ;;  %v6735_v16 = vld [vmem:[#allocation76_spill] sm:$0xff] }
 0x137   :  { %3873 = vmatpush3.bf16.msra.mxu0 %v5941_v51  ;;  %v3904_v21 = vpack.c.bf16 %v2168_v52, %v2161_v50  ;;  %3903 = vmatprep.subr.bf16.mxu1 %v3902_v3  ;;  %v3918_v1 = vpack.c.bf16 %v5381_v18, %v5368_v30  ;;  %v6724_v53 = vand.u32 4294901760, %v6718_v36  ;;  %v3920_v62 = vpack.c.bf16 %v5400_v46, %v5386_v28  ;;  %v6732_v41 = vld [vmem:[#allocation73_spill] sm:$0xff]  ;;  %v6738_v50 = vld [vmem:[#allocation79_spill] sm:$0xff]  ;;  %v6743_v22 = vld [vmem:[#allocation84_spill] sm:$0xff] }
 0x138   :  { %3907 = vmatprep.subr.bf16.mxu0 %v3906_v0  ;;  %v3922_v13 = vpack.c.bf16 %v5419_v20, %v5414_v37  ;;  %v3924_v30 = vpack.c.bf16 %v5449_v6, %v5424_v2  ;;  %v3926_v18 = vpack.c.bf16 %v5475_v4, %v5464_v45  ;;  %v3928_v46 = vpack.c.bf16 %v5491_v27, %v5480_v54  ;;  %v6725_v20 = vld [vmem:[#allocation30_spill] sm:$0xff]  ;;  %v6726_v37 = vld [vmem:[#allocation13_spill] sm:$0xff]  ;;  %v2860_v2 = vpop.f32.mrb[0].mxu0  ;;  %v2827_v4 = vld [vmem:[%s6053_s2] ss:$0 sm:$0xff] }
 0x139   :  { %v3930_v28 = vpack.c.bf16 %v5501_v10, %v5496_v42  ;;  %v2861_v6 = vpop.f32.mrb[1].mxu0  ;;  %v3932_v45 = vpack.c.bf16 %v5513_v11, %v5508_v15  ;;  %v3934_v54 = vpack.c.bf16 %v5523_v63, %v5518_v49  ;;  %v3936_v11 = vpack.c.bf16 %v5547_v32, %v5531_v23  ;;  %v6728_v49 = vld [vmem:[#allocation26_spill] sm:$0xff]  ;;  %v6729_v63 = vld [vmem:[#allocation45_spill] sm:$0xff]  ;;  %v6731_v23 = vld [vmem:[#allocation72_spill] sm:$0xff] }
 0x13a   :  { %2053 = vmatmul.mubr.f32.vlgmr.msra.gmra.mrb[12].mxu0 %v2052_v44  ;;  %3905 = vmatpush3.bf16.msra.mxu1 %v3904_v21  ;;  %v2862_v12 = vadd.f32 %v2861_v6, %v2860_v2  ;;  %v2895_v27 = vpop.f32.mrb[0].mxu1  ;;  %v6730_v32 = vld [vmem:[#allocation37_spill] sm:$0xff]  ;;  %v6734_v0 = vld [vmem:[#allocation75_spill] sm:$0xff] }
 0x13b   :  { %3909 = vmatpush3.bf16.msra.mxu0 %v3908_v31  ;;  %2420 = vmatprep.mubr.f32.mxu0 %v6718_v36  ;;  %v2896_v42 = vpop.f32.mrb[1].mxu1  ;;  %v6740_v44 = vld [vmem:[#allocation81_spill] sm:$0xff]  ;;  %v6741_v31 = vld [vmem:[#allocation82_spill] sm:$0xff] }
 0x13c   :  { %3911 = vmatprep.subr.bf16.mxu0 %v3910_v33  ;;  %3939 = vmatprep.subr.bf16.mxu1 %v6720_v35  ;;  %v331_v10 = vadd.f32 %v2862_v12, %v2827_v4  ;;  %v2897_v15 = vadd.f32 %v2896_v42, %v2895_v27  ;;  %v6742_v33 = vld [vmem:[#allocation83_spill] sm:$0xff] }
 0x13d   :  { %2285 = vmatmul.mubr.f32.vlgmr.msra.gmra.mrb[12].mxu1 %v5861_v40 }
 0x13e   :  { %3941 = vmatpush3.bf16.msra.mxu1 %v6722_v25  ;;  %2527 = vmatprep.mubr.f32.mxu1 %v6724_v53  ;;  %v563_v56 = vadd.f32 %v2897_v15, %v331_v10 }
 0x13f   :  { %3913 = vmatpush3.bf16.msra.mxu0 %v3912_v14  ;;  %3943 = vmatprep.subr.bf16.mxu1 %v6723_v7 }
 0x140   :  { %3915 = vmatprep.subr.bf16.mxu0 %v3914_v48 }
 0x142   :  { %3945 = vmatpush3.bf16.msra.mxu1 %v5776_v34 }
 0x143   :  { %3917 = vmatpush3.bf16.msra.mxu0 %v3916_v60  ;;  %3947 = vmatprep.subr.bf16.mxu1 %v5791_v26 }
 0x144   :  { %3919 = vmatprep.subr.bf16.mxu0 %v3918_v1 }
 0x146   :  { %3949 = vmatpush3.bf16.msra.mxu1 %v5803_v59 }
 0x147   :  { %3921 = vmatpush3.bf16.msra.mxu0 %v3920_v62  ;;  %3951 = vmatprep.subr.bf16.mxu1 %v5811_v19 }
 0x148   :  { %3923 = vmatprep.subr.bf16.mxu0 %v3922_v13 }
 0x14a   :  { %3953 = vmatpush3.bf16.msra.mxu1 %v6725_v20 }
 0x14b   :  { %3925 = vmatpush3.bf16.msra.mxu0 %v3924_v30  ;;  %3955 = vmatprep.subr.bf16.mxu1 %v6726_v37 }
 0x14c   :  { %3927 = vmatprep.subr.bf16.mxu0 %v3926_v18 }
 0x14e   :  { %3957 = vmatpush3.bf16.msra.mxu1 %v5859_v9 }
 0x14f   :  { %3929 = vmatpush3.bf16.msra.mxu0 %v3928_v46  ;;  %3959 = vmatprep.subr.bf16.mxu1 %v5875_v8 }
 0x150   :  { %3931 = vmatprep.subr.bf16.mxu0 %v3930_v28 }
 0x152   :  { %3961 = vmatpush3.bf16.msra.mxu1 %v5887_v55 }
 0x153   :  { %3933 = vmatpush3.bf16.msra.mxu0 %v3932_v45  ;;  %3963 = vmatprep.subr.bf16.mxu1 %v5897_v57 }
 0x154   :  { %3935 = vmatprep.subr.bf16.mxu0 %v3934_v54 }
 0x155   :  { %v2930_v52 = vpop.f32.mrb[2].mxu0 }
 0x156   :  { %3965 = vmatpush3.bf16.msra.mxu1 %v5918_v29 }
 0x157   :  { %3937 = vmatpush3.bf16.msra.mxu0 %v3936_v11  ;;  %3967 = vmatprep.subr.bf16.mxu1 %v5924_v24 }
 0x158   :  { %3971 = vmatprep.subr.bf16.mxu0 %v6727_v39 }
 0x15a   :  { %2423 = vmatmul.mubr.f32.vlgmr.msra.gmra.mrb[14].mxu0 %v5890_v58  ;;  %3969 = vmatpush3.bf16.msra.mxu1 %v5941_v51  ;;  %v6736_v58 = vld [vmem:[#allocation77_spill] sm:$0xff] }
 0x15b   :  { %3973 = vmatpush3.bf16.msra.mxu0 %v6728_v49  ;;  %2697 = vmatprep.mubr.f32.mxu0 %v6729_v63 }
 0x15c   :  { %3975 = vmatprep.subr.bf16.mxu0 %v6730_v32  ;;  %4003 = vmatprep.subr.bf16.mxu1 %v6720_v35 }
 0x15d   :  { %2531 = vmatmul.mubr.f32.vlgmr.msra.gmra.mrb[14].mxu1 %v2050_v43  ;;  %v6737_v43 = vld [vmem:[#allocation78_spill] sm:$0xff] }
 0x15e   :  { %4005 = vmatpush3.bf16.msra.mxu1 %v6722_v25  ;;  %2801 = vmatprep.mubr.f32.mxu1 %v6729_v63 }
 0x15f   :  { %3977 = vmatpush3.bf16.msra.mxu0 %v6731_v23  ;;  %4007 = vmatprep.subr.bf16.mxu1 %v6723_v7 }
 0x160   :  { %3979 = vmatprep.subr.bf16.mxu0 %v6732_v41 }
 0x162   :  { %4009 = vmatpush3.bf16.msra.mxu1 %v5776_v34  ;;  %v2931_v34 = vpop.f32.mrb[3].mxu0 }
 0x163   :  { %3981 = vmatpush3.bf16.msra.mxu0 %v6733_v17  ;;  %4011 = vmatprep.subr.bf16.mxu1 %v5791_v26  ;;  %v2932_v3 = vadd.f32 %v2931_v34, %v2930_v52  ;;  %v6739_v26 = vld [vmem:[#allocation80_spill] sm:$0xff] }
 0x164   :  { %3983 = vmatprep.subr.bf16.mxu0 %v6734_v0 }
 0x166   :  { %4013 = vmatpush3.bf16.msra.mxu1 %v5803_v59  ;;  %v701_v59 = vadd.f32 %v2932_v3, %v563_v56 }
 0x167   :  { %3985 = vmatpush3.bf16.msra.mxu0 %v6735_v16  ;;  %4015 = vmatprep.subr.bf16.mxu1 %v5811_v19  ;;  %v2965_v19 = vpop.f32.mrb[2].mxu1 }
 0x168   :  { %3987 = vmatprep.subr.bf16.mxu0 %v6736_v58  ;;  %v2966_v5 = vpop.f32.mrb[3].mxu1 }
 0x169   :  { %v2967_v47 = vadd.f32 %v2966_v5, %v2965_v19 }
 0x16a   :  { %4017 = vmatpush3.bf16.msra.mxu1 %v6725_v20 }
 0x16b   :  { %3989 = vmatpush3.bf16.msra.mxu0 %v6737_v43  ;;  %4019 = vmatprep.subr.bf16.mxu1 %v6726_v37  ;;  %v809_v21 = vadd.f32 %v2967_v47, %v701_v59 }
 0x16c   :  { %3991 = vmatprep.subr.bf16.mxu0 %v6738_v50 }
 0x16e   :  { %4021 = vmatpush3.bf16.msra.mxu1 %v5859_v9 }
 0x16f   :  { %3993 = vmatpush3.bf16.msra.mxu0 %v6739_v26  ;;  %4023 = vmatprep.subr.bf16.mxu1 %v5875_v8 }
 0x170   :  { %3995 = vmatprep.subr.bf16.mxu0 %v6740_v44 }
 0x172   :  { %4025 = vmatpush3.bf16.msra.mxu1 %v5887_v55 }
 0x173   :  { %3997 = vmatpush3.bf16.msra.mxu0 %v6741_v31  ;;  %4027 = vmatprep.subr.bf16.mxu1 %v5897_v57 }
 0x174   :  { %3999 = vmatprep.subr.bf16.mxu0 %v6742_v33 }
 0x175   :  { %v3000_v9 = vpop.f32.mrb[4].mxu0 }
 0x176   :  { %4029 = vmatpush3.bf16.msra.mxu1 %v5918_v29  ;;  %v3001_v8 = vpop.f32.mrb[5].mxu0 }
 0x177   :  { %4001 = vmatpush3.bf16.msra.mxu0 %v6743_v22  ;;  %4031 = vmatprep.subr.bf16.mxu1 %v5924_v24  ;;  %v3002_v14 = vadd.f32 %v3001_v8, %v3000_v9 }
 0x179   :  { %v977_v36 = vadd.f32 %v3002_v14, %v809_v21 }
 0x17a   :  { %2699 = vmatmul.mubr.f32.vlgmr.msra.gmra.mrb[16].mxu0 %v5861_v40  ;;  %4033 = vmatpush3.bf16.msra.mxu1 %v5941_v51  ;;  %v3035_v55 = vpop.f32.mrb[4].mxu1 }
 0x17b   :  { %v3036_v38 = vpop.f32.mrb[5].mxu1 }
 0x17c   :  { %v3037_v57 = vadd.f32 %v3036_v38, %v3035_v55 }
 0x17d   :  { %2803 = vmatmul.mubr.f32.vlgmr.msra.gmra.mrb[16].mxu1 %v5861_v40 }
 0x17e   :  { %v1081_v48 = vadd.f32 %v3037_v57, %v977_v36 }
 0x1a1   :  { %v3070_v35 = vpop.f32.mrb[6].mxu0 }
 0x1a2   :  { %v3071_v61 = vpop.f32.mrb[7].mxu0 }
 0x1a3   :  { %v3072_v60 = vadd.f32 %v3071_v61, %v3070_v35 }
 0x1a4   :  { %v3105_v25 = vpop.f32.mrb[6].mxu1 }
 0x1a5   :  { %v1193_v29 = vadd.f32 %v3072_v60, %v1081_v48  ;;  %v3106_v24 = vpop.f32.mrb[7].mxu1 }
 0x1a6   :  { %v3107_v1 = vadd.f32 %v3106_v24, %v3105_v25 }
 0x1a8   :  { %v1425_v7 = vadd.f32 %v3107_v1, %v1193_v29 }
 0x1cb   :  { %v3175_v13 = vpop.f32.mrb[8].mxu1 }
 0x1cc   :  { %v3140_v53 = vpop.f32.mrb[8].mxu0  ;;  %v3176_v30 = vpop.f32.mrb[9].mxu1 }
 0x1cd   :  { %v3141_v51 = vpop.f32.mrb[9].mxu0  ;;  %v3177_v18 = vadd.f32 %v3176_v30, %v3175_v13 }
 0x1ce   :  { %v3142_v62 = vadd.f32 %v3141_v51, %v3140_v53 }
 0x1d0   :  { %v1563_v40 = vadd.f32 %v3142_v62, %v1425_v7 }
 0x1d2   :  { %v1671_v46 = vadd.f32 %v3177_v18, %v1563_v40 }
 0x1eb   :  { %v3245_v6 = vpop.f32.mrb[10].mxu1 }
 0x1ec   :  { %v3210_v20 = vpop.f32.mrb[10].mxu0  ;;  %v3246_v45 = vpop.f32.mrb[11].mxu1 }
 0x1ed   :  { %v3211_v28 = vpop.f32.mrb[11].mxu0  ;;  %v3247_v4 = vadd.f32 %v3246_v45, %v3245_v6 }
 0x1ee   :  { %v3212_v37 = vadd.f32 %v3211_v28, %v3210_v20 }
 0x1f0   :  { %v1839_v2 = vadd.f32 %v3212_v37, %v1671_v46 }
 0x1f2   :  { %v1943_v12 = vadd.f32 %v3247_v4, %v1839_v2 }
 0x20d   :  { %v3280_v54 = vpop.f32.mrb[12].mxu0 }
 0x20e   :  { %v3281_v10 = vpop.f32.mrb[13].mxu0 }
 0x20f   :  { %v3282_v27 = vadd.f32 %v3281_v10, %v3280_v54 }
 0x210   :  { %v3315_v11 = vpop.f32.mrb[12].mxu1 }
 0x211   :  { %v2055_v42 = vadd.f32 %v3282_v27, %v1943_v12  ;;  %v3316_v15 = vpop.f32.mrb[13].mxu1 }
 0x212   :  { %v3317_v56 = vadd.f32 %v3316_v15, %v3315_v11 }
 0x214   :  { %v2287_v39 = vadd.f32 %v3317_v56, %v2055_v42 }
 0x22d   :  { %v3350_v49 = vpop.f32.mrb[14].mxu0 }
 0x22e   :  { %v3351_v63 = vpop.f32.mrb[15].mxu0 }
 0x22f   :  { %v3352_v32 = vadd.f32 %v3351_v63, %v3350_v49 }
 0x230   :  { %v3385_v41 = vpop.f32.mrb[14].mxu1 }
 0x231   :  { %v2425_v23 = vadd.f32 %v3352_v32, %v2287_v39  ;;  %v3386_v17 = vpop.f32.mrb[15].mxu1 }
 0x232   :  { %v3387_v0 = vadd.f32 %v3386_v17, %v3385_v41 }
 0x234   :  { %v2533_v16 = vadd.f32 %v3387_v0, %v2425_v23 }
 0x24d   :  { %v3420_v58 = vpop.f32.mrb[16].mxu0 }
 0x24e   :  { %v3421_v43 = vpop.f32.mrb[17].mxu0 }
 0x24f   :  { %v3422_v50 = vadd.f32 %v3421_v43, %v3420_v58 }
 0x250   :  { %v3455_v34 = vpop.f32.mrb[16].mxu1 }
 0x251   :  { %v2701_v52 = vadd.f32 %v3422_v50, %v2533_v16  ;;  %v3456_v3 = vpop.f32.mrb[17].mxu1 }
 0x252   :  { %v3457_v26 = vadd.f32 %v3456_v3, %v3455_v34 }
 0x254   :  { %v2805_v44 = vadd.f32 %v3457_v26, %v2701_v52 }
 0x256   :  { %2808 = vst [vmem:[#allocation7] sm:$0xff] %v2805_v44 }
 0x257   :  { %2813 = vsyncadd [#allocation4], 96  ;;  %s4131_s2 = smov [#allocation7]  }
 0x258   :  { %s2814_s14 = sshll.u32 %s4131_s2, 4  ;;  %s2815_s14 = int_to_ptr.vmem [resolvable:$true] %s2814_s14 }
 0x259   :  { %s4096_s15 = scalar_lea.vmem %s2815_s14, 32  ;;  %s4100_s16 = scalar_lea.vmem %s2815_s14, 128 }
 0x25a   :  { %p4097_p2 = scmp.ne.s32.totalorder %s2815_s14, %s4096_s15  ;;  %p4101_p3 = scmp.lt.s32.totalorder %s2815_s14, %s2815_s14 }
 0x25b   :  { %p4102_p4 = scmp.lt.s32.totalorder %s4100_s16, %s4096_s15 }
 0x25d   :  { %p4103_p5 = por %p4102_p4, %p4101_p3 }
 0x25f   :  { %p4104_p6 = pnand %p4103_p5, %p4097_p2 }
 0x261   :  { %4107 = shalt.err (!%p4104_p6)
}
 0x262   :  { %s4108_s19 = scalar_lea.hbm %s6054_s3, 32 }
 0x263   :  { %p4109_p7 = scmp.ne.s32.totalorder %s6054_s3, %s4108_s19  ;;  %p4112_p8 = scmp.lt.u32.totalorder %s4108_s19, %s6054_s3 }
 0x265   :  { %p4114_p9 = pnand %p4112_p8, %p4109_p7 }
 0x267   :  { %4117 = shalt.err (!%p4114_p9)
}
 0x268   :  { %s4132_s24 = smov 32   ;;  %s4133_s25 = smov 2  }
 0x269   :  { %2820 = dma.vmem_to_hbm [thread:$0]  %s2815_s14, 32, %s6054_s3, [#allocation4], %s4132_s24, %s4132_s24, %s4133_s25  }
 0x26a   :  { %4122 = dma.done.wait [#allocation4], 128  }
 0x26b   :  { %4123 = vsyncadd [#allocation4], 4294967168 }
 0x26c   :  { %2824 = vsyncpa [#allocation3], 1 }
 0x26d   :  { %2825 = vsyncpa [#allocation6], 1 }
 0x26e   :  { %2826 = vsyncpa [#allocation4], 1 }

</bundles_post_ra>
